<compile_context>
chip_gen: v5e
topology: v5e:2x2
jax: 0.10.0
libtpu: 0.0.40
codegen_flags: <defaults>
</compile_context>

<pallas_src>
import functools

import jax
import jax.numpy as jnp
from jax.experimental import pallas as pl
from jax.experimental.pallas import tpu as pltpu


def gru_last_hidden_kernel(x_ref, wih_ref, whh_ref, bgi_ref, bhn_ref,
                           out_ref, gi_ref, *, T, B, nh):
    """Single invocation: whole sequence in VMEM, unrolled time loop inside.

    x_ref   : (T*B, nx)  bf16   flattened input sequence
    wih_ref : (nx, 3*nh) bf16   input->gates weights (pre-transposed)
    whh_ref : (nh, 3*nh) bf16   hidden->gates weights (pre-transposed)
    bgi_ref : (1, 3*nh)  f32    b_ih with (b_hr, b_hz) pre-folded in
    bhn_ref : (1, nh)    f32    b_hn (must stay inside the r-gate)
    out_ref : (B, nh)    f32    last hidden state
    gi_ref  : (T*B, 3*nh) f32   VMEM scratch for the hoisted input projection
    """
    # Hoisted input projection for ALL time steps: one M = T*B matmul on the MXU,
    # bias broadcast/add done exactly once (outside the serial chain).
    gi_ref[...] = (
        jnp.dot(x_ref[...], wih_ref[...], preferred_element_type=jnp.float32)
        + bgi_ref[...]
    )
    b_hn = bhn_ref[...]                      # (1, nh), hoisted above the loop

    h = jnp.zeros((B, nh), jnp.float32)

    # Fully unrolled serial recurrence (T is a small static trip count).
    for t in range(T):
        gi = gi_ref[pl.ds(t * B, B), :]      # (B, 3*nh) slice of precomputed proj
        gh = jnp.dot(h.astype(jnp.bfloat16), whh_ref[...],
                     preferred_element_type=jnp.float32)           # (B, 3*nh)

        # Coalesced r/z sigmoid on one (B, 2*nh) slab (single wider EUP push).
        rz = jax.nn.sigmoid(gi[:, :2 * nh] + gh[:, :2 * nh])
        r = rz[:, :nh]
        z = rz[:, nh:]
        n = jnp.tanh(gi[:, 2 * nh:] + r * (gh[:, 2 * nh:] + b_hn))
        h = (1.0 - z) * n + z * h

    out_ref[...] = h.astype(out_ref.dtype)


def motion_gru_s1_forward(x, w_ih, w_hh, b_ih, b_hh):
    """x: (T, B, nx) f32. Weights pre-transposed to (in_features, 3*nh).

    Returns the last hidden state (B, nh) in f32, matching
    MotionGRU_S1.forward -> encode_x -> rnn_out[-1].
    """
    T, B, nx = x.shape
    nh = w_hh.shape[0]
    g3 = 3 * nh

    # --- parameter preprocessing (one-time, outside the kernel) ---------------
    # Fold b_ih plus the r/z parts of b_hh into one bias added to the hoisted
    # input projection; keep b_hn separate (it sits inside the r-gating).
    b_gi = (b_ih + jnp.concatenate(
        [b_hh[:, :2 * nh], jnp.zeros((1, nh), b_hh.dtype)], axis=1)
            ).astype(jnp.float32)
    b_hn = b_hh[:, 2 * nh:].astype(jnp.float32)

    # bf16 operands for the MXU; accumulation stays f32 inside the kernel.
    x2d = x.reshape(T * B, nx).astype(jnp.bfloat16)
    w_ih_b = w_ih.astype(jnp.bfloat16)
    w_hh_b = w_hh.astype(jnp.bfloat16)

    kernel = functools.partial(gru_last_hidden_kernel, T=T, B=B, nh=nh)

    vmem = pl.BlockSpec(memory_space=pltpu.MemorySpace.VMEM)
    return pl.pallas_call(
        kernel,
        out_shape=jax.ShapeDtypeStruct((B, nh), jnp.float32),
        in_specs=[vmem, vmem, vmem, vmem, vmem],
        out_specs=vmem,
        scratch_shapes=[pltpu.VMEM((T * B, g3), jnp.float32)],
    )(x2d, w_ih_b, w_hh_b, b_gi, b_hn)


def gru_reference(x, w_ih, w_hh, b_ih, b_hh, matmul_dtype=jnp.float32):
    """Pure-JAX reference (lax.scan) matching PyTorch GRUCell semantics.

    matmul_dtype lets us build (a) the exact f32 PyTorch-equivalent reference
    and (b) a bf16-MXU-operand reference that mirrors the kernel's precision.
    """
    T, B, nx = x.shape
    nh = w_hh.shape[0]
    wi = w_ih.astype(matmul_dtype)
    wh = w_hh.astype(matmul_dtype)

    def step(h, x_t):
        gi = jnp.dot(x_t.astype(matmul_dtype), wi,
                     preferred_element_type=jnp.float32) + b_ih[0]
        gh = jnp.dot(h.astype(matmul_dtype), wh,
                     preferred_element_type=jnp.float32) + b_hh[0]
        i_r, i_z, i_n = gi[:, :nh], gi[:, nh:2 * nh], gi[:, 2 * nh:]
        h_r, h_z, h_n = gh[:, :nh], gh[:, nh:2 * nh], gh[:, 2 * nh:]
        r = jax.nn.sigmoid(i_r + h_r)
        z = jax.nn.sigmoid(i_z + h_z)
        n = jnp.tanh(i_n + r * h_n)
        h_new = (1.0 - z) * n + z * h
        return h_new, None

    h0 = jnp.zeros((B, nh), jnp.float32)
    h_last, _ = jax.lax.scan(step, h0, x)
    return h_last


if __name__ == "__main__":
    # config.motion_shape -> nx ; nh_rnn is fixed to 128 in the module.
    T, B, nx, nh = 8, 8, 32, 128

    key = jax.random.PRNGKey(0)
    k_x, k_wih, k_whh, k_bih, k_bhh = jax.random.split(key, 5)

    # PyTorch GRUCell init: U(-1/sqrt(nh), 1/sqrt(nh)).
    bound = 1.0 / jnp.sqrt(jnp.float32(nh))
    x = jax.random.normal(k_x, (T, B, nx), jnp.float32)
    # PyTorch stores weight_ih as (3*nh, nx); pre-transposed to (nx, 3*nh) for x @ W.
    w_ih = jax.random.uniform(k_wih, (nx, 3 * nh), jnp.float32, -bound, bound)
    w_hh = jax.random.uniform(k_whh, (nh, 3 * nh), jnp.float32, -bound, bound)
    b_ih = jax.random.uniform(k_bih, (1, 3 * nh), jnp.float32, -bound, bound)
    b_hh = jax.random.uniform(k_bhh, (1, 3 * nh), jnp.float32, -bound, bound)

    h_x = jax.block_until_ready(
        jax.jit(motion_gru_s1_forward)(x, w_ih, w_hh, b_ih, b_hh))
    assert h_x.shape == (B, nh)

    # (a) tight check vs. a reference using the same bf16 MXU-operand precision
    #     (validates gate order / bias folding / recurrence logic).
    h_ref_bf16 = jax.block_until_ready(
        gru_reference(x, w_ih, w_hh, b_ih, b_hh, matmul_dtype=jnp.bfloat16))
    assert jnp.allclose(h_x, h_ref_bf16, atol=1e-3, rtol=1e-3), \
        "mismatch vs bf16-matmul reference"

    # (b) loose check vs. the exact f32 PyTorch-equivalent reference
    #     (bf16 MXU operands introduce ~1e-3..1e-2 level differences).
    h_ref_f32 = jax.block_until_ready(
        gru_reference(x, w_ih, w_hh, b_ih, b_hh, matmul_dtype=jnp.float32))
    assert jnp.allclose(h_x, h_ref_f32, atol=3e-2, rtol=3e-2), \
        "mismatch vs f32 reference"

    print("KERNEL_OK")
</pallas_src>

<mosaic_0001>
module attributes {stable_mosaic.version = 11 : i64} {
  func.func @gru_last_hidden_kernel(%arg0: memref<64x32xbf16, #tpu.memory_space<vmem>>, %arg1: memref<32x384xbf16, #tpu.memory_space<vmem>>, %arg2: memref<128x384xbf16, #tpu.memory_space<vmem>>, %arg3: memref<1x384xf32, #tpu.memory_space<vmem>>, %arg4: memref<1x128xf32, #tpu.memory_space<vmem>>, %arg5: memref<8x128xf32, #tpu.memory_space<vmem>>, %arg6: memref<64x384xf32, #tpu.memory_space<vmem>>) attributes {dimension_semantics = [], scalar_prefetch = 0 : i64, scratch_operands = 1 : i64, tpu.core_type = #tpu.core_type<tc>} {
    %c0 = arith.constant 0 : index
    %c0_0 = arith.constant 0 : index
    %0 = vector.load %arg0[%c0, %c0_0] : memref<64x32xbf16, #tpu.memory_space<vmem>>, vector<64x32xbf16>
    %c0_1 = arith.constant 0 : index
    %c0_2 = arith.constant 0 : index
    %1 = vector.load %arg1[%c0_1, %c0_2] : memref<32x384xbf16, #tpu.memory_space<vmem>>, vector<32x384xbf16>
    %cst = arith.constant dense<0.000000e+00> : vector<64x384xf32>
    %2 = tpu.matmul %0, %1, %cst {dimension_numbers = #tpu.dot_dimension_numbers<[1], [0], [0], [1], [0, 0, 1, 1], [], []>} : vector<64x32xbf16>, vector<32x384xbf16>, vector<64x384xf32> -> vector<64x384xf32>
    %c0_3 = arith.constant 0 : index
    %c0_4 = arith.constant 0 : index
    %3 = vector.load %arg3[%c0_3, %c0_4] : memref<1x384xf32, #tpu.memory_space<vmem>>, vector<1x384xf32>
    %4 = vector.broadcast %3 : vector<1x384xf32> to vector<64x384xf32>
    %5 = arith.addf %2, %4 : vector<64x384xf32>
    %c0_5 = arith.constant 0 : index
    %c0_6 = arith.constant 0 : index
    %6 = vector.load %arg6[%c0_5, %c0_6] : memref<64x384xf32, #tpu.memory_space<vmem>>, vector<64x384xf32>
    tpu.vector_store %arg6[%c0_5, %c0_6], %5 {strides = array<i32>} : memref<64x384xf32, #tpu.memory_space<vmem>>, vector<64x384xf32>,
    %c0_7 = arith.constant 0 : index
    %c0_8 = arith.constant 0 : index
    %7 = vector.load %arg4[%c0_7, %c0_8] : memref<1x128xf32, #tpu.memory_space<vmem>>, vector<1x128xf32>
    %cst_9 = arith.constant 0.000000e+00 : f32
    %8 = vector.broadcast %cst_9 : f32 to vector<8x128xf32>
    %c0_10 = arith.constant 0 : index
    %c0_11 = arith.constant 0 : index
    %9 = vector.load %arg6[%c0_10, %c0_11] : memref<64x384xf32, #tpu.memory_space<vmem>>, vector<8x384xf32>
    %10 = arith.truncf %8 : vector<8x128xf32> to vector<8x128xbf16>
    %c0_12 = arith.constant 0 : index
    %c0_13 = arith.constant 0 : index
    %11 = vector.load %arg2[%c0_12, %c0_13] : memref<128x384xbf16, #tpu.memory_space<vmem>>, vector<128x384xbf16>
    %cst_14 = arith.constant dense<0.000000e+00> : vector<8x384xf32>
    %12 = tpu.matmul %10, %11, %cst_14 {dimension_numbers = #tpu.dot_dimension_numbers<[1], [0], [0], [1], [0, 0, 1, 1], [], []>} : vector<8x128xbf16>, vector<128x384xbf16>, vector<8x384xf32> -> vector<8x384xf32>
    %13 = vector.extract_strided_slice %9 {offsets = [0, 0], sizes = [8, 256], strides = [1, 1]} : vector<8x384xf32> to vector<8x256xf32>
    %14 = vector.extract_strided_slice %12 {offsets = [0, 0], sizes = [8, 256], strides = [1, 1]} : vector<8x384xf32> to vector<8x256xf32>
    %15 = arith.addf %13, %14 : vector<8x256xf32>
    %16 = arith.negf %15 : vector<8x256xf32>
    %17 = math.exp %16 : vector<8x256xf32>
    %cst_15 = arith.constant 1.000000e+00 : f32
    %18 = vector.broadcast %cst_15 : f32 to vector<8x256xf32>
    %19 = arith.addf %18, %17 : vector<8x256xf32>
    %20 = arith.divf %18, %19 : vector<8x256xf32>
    %21 = vector.extract_strided_slice %20 {offsets = [0, 0], sizes = [8, 128], strides = [1, 1]} : vector<8x256xf32> to vector<8x128xf32>
    %22 = vector.extract_strided_slice %20 {offsets = [0, 128], sizes = [8, 128], strides = [1, 1]} : vector<8x256xf32> to vector<8x128xf32>
    %23 = vector.extract_strided_slice %9 {offsets = [0, 256], sizes = [8, 128], strides = [1, 1]} : vector<8x384xf32> to vector<8x128xf32>
    %24 = vector.extract_strided_slice %12 {offsets = [0, 256], sizes = [8, 128], strides = [1, 1]} : vector<8x384xf32> to vector<8x128xf32>
    %25 = vector.broadcast %7 : vector<1x128xf32> to vector<8x128xf32>
    %26 = arith.addf %24, %25 : vector<8x128xf32>
    %27 = arith.mulf %21, %26 : vector<8x128xf32>
    %28 = arith.addf %23, %27 : vector<8x128xf32>
    %29 = math.tanh %28 : vector<8x128xf32>
    %cst_16 = arith.constant 1.000000e+00 : f32
    %30 = vector.broadcast %cst_16 : f32 to vector<8x128xf32>
    %31 = arith.subf %30, %22 : vector<8x128xf32>
    %32 = arith.mulf %31, %29 : vector<8x128xf32>
    %33 = arith.mulf %22, %8 : vector<8x128xf32>
    %34 = arith.addf %32, %33 : vector<8x128xf32>
    %c8 = arith.constant 8 : index
    %c0_17 = arith.constant 0 : index
    %35 = vector.load %arg6[%c8, %c0_17] : memref<64x384xf32, #tpu.memory_space<vmem>>, vector<8x384xf32>
    %36 = arith.truncf %34 : vector<8x128xf32> to vector<8x128xbf16>
    %c0_18 = arith.constant 0 : index
    %c0_19 = arith.constant 0 : index
    %37 = vector.load %arg2[%c0_18, %c0_19] : memref<128x384xbf16, #tpu.memory_space<vmem>>, vector<128x384xbf16>
    %cst_20 = arith.constant dense<0.000000e+00> : vector<8x384xf32>
    %38 = tpu.matmul %36, %37, %cst_20 {dimension_numbers = #tpu.dot_dimension_numbers<[1], [0], [0], [1], [0, 0, 1, 1], [], []>} : vector<8x128xbf16>, vector<128x384xbf16>, vector<8x384xf32> -> vector<8x384xf32>
    %39 = vector.extract_strided_slice %35 {offsets = [0, 0], sizes = [8, 256], strides = [1, 1]} : vector<8x384xf32> to vector<8x256xf32>
    %40 = vector.extract_strided_slice %38 {offsets = [0, 0], sizes = [8, 256], strides = [1, 1]} : vector<8x384xf32> to vector<8x256xf32>
    %41 = arith.addf %39, %40 : vector<8x256xf32>
    %42 = arith.negf %41 : vector<8x256xf32>
    %43 = math.exp %42 : vector<8x256xf32>
    %cst_21 = arith.constant 1.000000e+00 : f32
    %44 = vector.broadcast %cst_21 : f32 to vector<8x256xf32>
    %45 = arith.addf %44, %43 : vector<8x256xf32>
    %46 = arith.divf %44, %45 : vector<8x256xf32>
    %47 = vector.extract_strided_slice %46 {offsets = [0, 0], sizes = [8, 128], strides = [1, 1]} : vector<8x256xf32> to vector<8x128xf32>
    %48 = vector.extract_strided_slice %46 {offsets = [0, 128], sizes = [8, 128], strides = [1, 1]} : vector<8x256xf32> to vector<8x128xf32>
    %49 = vector.extract_strided_slice %35 {offsets = [0, 256], sizes = [8, 128], strides = [1, 1]} : vector<8x384xf32> to vector<8x128xf32>
    %50 = vector.extract_strided_slice %38 {offsets = [0, 256], sizes = [8, 128], strides = [1, 1]} : vector<8x384xf32> to vector<8x128xf32>
    %51 = vector.broadcast %7 : vector<1x128xf32> to vector<8x128xf32>
    %52 = arith.addf %50, %51 : vector<8x128xf32>
    %53 = arith.mulf %47, %52 : vector<8x128xf32>
    %54 = arith.addf %49, %53 : vector<8x128xf32>
    %55 = math.tanh %54 : vector<8x128xf32>
    %cst_22 = arith.constant 1.000000e+00 : f32
    %56 = vector.broadcast %cst_22 : f32 to vector<8x128xf32>
    %57 = arith.subf %56, %48 : vector<8x128xf32>
    %58 = arith.mulf %57, %55 : vector<8x128xf32>
    %59 = arith.mulf %48, %34 : vector<8x128xf32>
    %60 = arith.addf %58, %59 : vector<8x128xf32>
    %c16 = arith.constant 16 : index
    %c0_23 = arith.constant 0 : index
    %61 = vector.load %arg6[%c16, %c0_23] : memref<64x384xf32, #tpu.memory_space<vmem>>, vector<8x384xf32>
    %62 = arith.truncf %60 : vector<8x128xf32> to vector<8x128xbf16>
    %c0_24 = arith.constant 0 : index
    %c0_25 = arith.constant 0 : index
    %63 = vector.load %arg2[%c0_24, %c0_25] : memref<128x384xbf16, #tpu.memory_space<vmem>>, vector<128x384xbf16>
    %cst_26 = arith.constant dense<0.000000e+00> : vector<8x384xf32>
    %64 = tpu.matmul %62, %63, %cst_26 {dimension_numbers = #tpu.dot_dimension_numbers<[1], [0], [0], [1], [0, 0, 1, 1], [], []>} : vector<8x128xbf16>, vector<128x384xbf16>, vector<8x384xf32> -> vector<8x384xf32>
    %65 = vector.extract_strided_slice %61 {offsets = [0, 0], sizes = [8, 256], strides = [1, 1]} : vector<8x384xf32> to vector<8x256xf32>
    %66 = vector.extract_strided_slice %64 {offsets = [0, 0], sizes = [8, 256], strides = [1, 1]} : vector<8x384xf32> to vector<8x256xf32>
    %67 = arith.addf %65, %66 : vector<8x256xf32>
    %68 = arith.negf %67 : vector<8x256xf32>
    %69 = math.exp %68 : vector<8x256xf32>
    %cst_27 = arith.constant 1.000000e+00 : f32
    %70 = vector.broadcast %cst_27 : f32 to vector<8x256xf32>
    %71 = arith.addf %70, %69 : vector<8x256xf32>
    %72 = arith.divf %70, %71 : vector<8x256xf32>
    %73 = vector.extract_strided_slice %72 {offsets = [0, 0], sizes = [8, 128], strides = [1, 1]} : vector<8x256xf32> to vector<8x128xf32>
    %74 = vector.extract_strided_slice %72 {offsets = [0, 128], sizes = [8, 128], strides = [1, 1]} : vector<8x256xf32> to vector<8x128xf32>
    %75 = vector.extract_strided_slice %61 {offsets = [0, 256], sizes = [8, 128], strides = [1, 1]} : vector<8x384xf32> to vector<8x128xf32>
    %76 = vector.extract_strided_slice %64 {offsets = [0, 256], sizes = [8, 128], strides = [1, 1]} : vector<8x384xf32> to vector<8x128xf32>
    %77 = vector.broadcast %7 : vector<1x128xf32> to vector<8x128xf32>
    %78 = arith.addf %76, %77 : vector<8x128xf32>
    %79 = arith.mulf %73, %78 : vector<8x128xf32>
    %80 = arith.addf %75, %79 : vector<8x128xf32>
    %81 = math.tanh %80 : vector<8x128xf32>
    %cst_28 = arith.constant 1.000000e+00 : f32
    %82 = vector.broadcast %cst_28 : f32 to vector<8x128xf32>
    %83 = arith.subf %82, %74 : vector<8x128xf32>
    %84 = arith.mulf %83, %81 : vector<8x128xf32>
    %85 = arith.mulf %74, %60 : vector<8x128xf32>
    %86 = arith.addf %84, %85 : vector<8x128xf32>
    %c24 = arith.constant 24 : index
    %c0_29 = arith.constant 0 : index
    %87 = vector.load %arg6[%c24, %c0_29] : memref<64x384xf32, #tpu.memory_space<vmem>>, vector<8x384xf32>
    %88 = arith.truncf %86 : vector<8x128xf32> to vector<8x128xbf16>
    %c0_30 = arith.constant 0 : index
    %c0_31 = arith.constant 0 : index
    %89 = vector.load %arg2[%c0_30, %c0_31] : memref<128x384xbf16, #tpu.memory_space<vmem>>, vector<128x384xbf16>
    %cst_32 = arith.constant dense<0.000000e+00> : vector<8x384xf32>
    %90 = tpu.matmul %88, %89, %cst_32 {dimension_numbers = #tpu.dot_dimension_numbers<[1], [0], [0], [1], [0, 0, 1, 1], [], []>} : vector<8x128xbf16>, vector<128x384xbf16>, vector<8x384xf32> -> vector<8x384xf32>
    %91 = vector.extract_strided_slice %87 {offsets = [0, 0], sizes = [8, 256], strides = [1, 1]} : vector<8x384xf32> to vector<8x256xf32>
    %92 = vector.extract_strided_slice %90 {offsets = [0, 0], sizes = [8, 256], strides = [1, 1]} : vector<8x384xf32> to vector<8x256xf32>
    %93 = arith.addf %91, %92 : vector<8x256xf32>
    %94 = arith.negf %93 : vector<8x256xf32>
    %95 = math.exp %94 : vector<8x256xf32>
    %cst_33 = arith.constant 1.000000e+00 : f32
    %96 = vector.broadcast %cst_33 : f32 to vector<8x256xf32>
    %97 = arith.addf %96, %95 : vector<8x256xf32>
    %98 = arith.divf %96, %97 : vector<8x256xf32>
    %99 = vector.extract_strided_slice %98 {offsets = [0, 0], sizes = [8, 128], strides = [1, 1]} : vector<8x256xf32> to vector<8x128xf32>
    %100 = vector.extract_strided_slice %98 {offsets = [0, 128], sizes = [8, 128], strides = [1, 1]} : vector<8x256xf32> to vector<8x128xf32>
    %101 = vector.extract_strided_slice %87 {offsets = [0, 256], sizes = [8, 128], strides = [1, 1]} : vector<8x384xf32> to vector<8x128xf32>
    %102 = vector.extract_strided_slice %90 {offsets = [0, 256], sizes = [8, 128], strides = [1, 1]} : vector<8x384xf32> to vector<8x128xf32>
    %103 = vector.broadcast %7 : vector<1x128xf32> to vector<8x128xf32>
    %104 = arith.addf %102, %103 : vector<8x128xf32>
    %105 = arith.mulf %99, %104 : vector<8x128xf32>
    %106 = arith.addf %101, %105 : vector<8x128xf32>
    %107 = math.tanh %106 : vector<8x128xf32>
    %cst_34 = arith.constant 1.000000e+00 : f32
    %108 = vector.broadcast %cst_34 : f32 to vector<8x128xf32>
    %109 = arith.subf %108, %100 : vector<8x128xf32>
    %110 = arith.mulf %109, %107 : vector<8x128xf32>
    %111 = arith.mulf %100, %86 : vector<8x128xf32>
    %112 = arith.addf %110, %111 : vector<8x128xf32>
    %c32 = arith.constant 32 : index
    %c0_35 = arith.constant 0 : index
    %113 = vector.load %arg6[%c32, %c0_35] : memref<64x384xf32, #tpu.memory_space<vmem>>, vector<8x384xf32>
    %114 = arith.truncf %112 : vector<8x128xf32> to vector<8x128xbf16>
    %c0_36 = arith.constant 0 : index
    %c0_37 = arith.constant 0 : index
    %115 = vector.load %arg2[%c0_36, %c0_37] : memref<128x384xbf16, #tpu.memory_space<vmem>>, vector<128x384xbf16>
    %cst_38 = arith.constant dense<0.000000e+00> : vector<8x384xf32>
    %116 = tpu.matmul %114, %115, %cst_38 {dimension_numbers = #tpu.dot_dimension_numbers<[1], [0], [0], [1], [0, 0, 1, 1], [], []>} : vector<8x128xbf16>, vector<128x384xbf16>, vector<8x384xf32> -> vector<8x384xf32>
    %117 = vector.extract_strided_slice %113 {offsets = [0, 0], sizes = [8, 256], strides = [1, 1]} : vector<8x384xf32> to vector<8x256xf32>
    %118 = vector.extract_strided_slice %116 {offsets = [0, 0], sizes = [8, 256], strides = [1, 1]} : vector<8x384xf32> to vector<8x256xf32>
    %119 = arith.addf %117, %118 : vector<8x256xf32>
    %120 = arith.negf %119 : vector<8x256xf32>
    %121 = math.exp %120 : vector<8x256xf32>
    %cst_39 = arith.constant 1.000000e+00 : f32
    %122 = vector.broadcast %cst_39 : f32 to vector<8x256xf32>
    %123 = arith.addf %122, %121 : vector<8x256xf32>
    %124 = arith.divf %122, %123 : vector<8x256xf32>
    %125 = vector.extract_strided_slice %124 {offsets = [0, 0], sizes = [8, 128], strides = [1, 1]} : vector<8x256xf32> to vector<8x128xf32>
    %126 = vector.extract_strided_slice %124 {offsets = [0, 128], sizes = [8, 128], strides = [1, 1]} : vector<8x256xf32> to vector<8x128xf32>
    %127 = vector.extract_strided_slice %113 {offsets = [0, 256], sizes = [8, 128], strides = [1, 1]} : vector<8x384xf32> to vector<8x128xf32>
    %128 = vector.extract_strided_slice %116 {offsets = [0, 256], sizes = [8, 128], strides = [1, 1]} : vector<8x384xf32> to vector<8x128xf32>
    %129 = vector.broadcast %7 : vector<1x128xf32> to vector<8x128xf32>
    %130 = arith.addf %128, %129 : vector<8x128xf32>
    %131 = arith.mulf %125, %130 : vector<8x128xf32>
    %132 = arith.addf %127, %131 : vector<8x128xf32>
    %133 = math.tanh %132 : vector<8x128xf32>
    %cst_40 = arith.constant 1.000000e+00 : f32
    %134 = vector.broadcast %cst_40 : f32 to vector<8x128xf32>
    %135 = arith.subf %134, %126 : vector<8x128xf32>
    %136 = arith.mulf %135, %133 : vector<8x128xf32>
    %137 = arith.mulf %126, %112 : vector<8x128xf32>
    %138 = arith.addf %136, %137 : vector<8x128xf32>
    %c40 = arith.constant 40 : index
    %c0_41 = arith.constant 0 : index
    %139 = vector.load %arg6[%c40, %c0_41] : memref<64x384xf32, #tpu.memory_space<vmem>>, vector<8x384xf32>
    %140 = arith.truncf %138 : vector<8x128xf32> to vector<8x128xbf16>
    %c0_42 = arith.constant 0 : index
    %c0_43 = arith.constant 0 : index
    %141 = vector.load %arg2[%c0_42, %c0_43] : memref<128x384xbf16, #tpu.memory_space<vmem>>, vector<128x384xbf16>
    %cst_44 = arith.constant dense<0.000000e+00> : vector<8x384xf32>
    %142 = tpu.matmul %140, %141, %cst_44 {dimension_numbers = #tpu.dot_dimension_numbers<[1], [0], [0], [1], [0, 0, 1, 1], [], []>} : vector<8x128xbf16>, vector<128x384xbf16>, vector<8x384xf32> -> vector<8x384xf32>
    %143 = vector.extract_strided_slice %139 {offsets = [0, 0], sizes = [8, 256], strides = [1, 1]} : vector<8x384xf32> to vector<8x256xf32>
    %144 = vector.extract_strided_slice %142 {offsets = [0, 0], sizes = [8, 256], strides = [1, 1]} : vector<8x384xf32> to vector<8x256xf32>
    %145 = arith.addf %143, %144 : vector<8x256xf32>
    %146 = arith.negf %145 : vector<8x256xf32>
    %147 = math.exp %146 : vector<8x256xf32>
    %cst_45 = arith.constant 1.000000e+00 : f32
    %148 = vector.broadcast %cst_45 : f32 to vector<8x256xf32>
    %149 = arith.addf %148, %147 : vector<8x256xf32>
    %150 = arith.divf %148, %149 : vector<8x256xf32>
    %151 = vector.extract_strided_slice %150 {offsets = [0, 0], sizes = [8, 128], strides = [1, 1]} : vector<8x256xf32> to vector<8x128xf32>
    %152 = vector.extract_strided_slice %150 {offsets = [0, 128], sizes = [8, 128], strides = [1, 1]} : vector<8x256xf32> to vector<8x128xf32>
    %153 = vector.extract_strided_slice %139 {offsets = [0, 256], sizes = [8, 128], strides = [1, 1]} : vector<8x384xf32> to vector<8x128xf32>
    %154 = vector.extract_strided_slice %142 {offsets = [0, 256], sizes = [8, 128], strides = [1, 1]} : vector<8x384xf32> to vector<8x128xf32>
    %155 = vector.broadcast %7 : vector<1x128xf32> to vector<8x128xf32>
    %156 = arith.addf %154, %155 : vector<8x128xf32>
    %157 = arith.mulf %151, %156 : vector<8x128xf32>
    %158 = arith.addf %153, %157 : vector<8x128xf32>
    %159 = math.tanh %158 : vector<8x128xf32>
    %cst_46 = arith.constant 1.000000e+00 : f32
    %160 = vector.broadcast %cst_46 : f32 to vector<8x128xf32>
    %161 = arith.subf %160, %152 : vector<8x128xf32>
    %162 = arith.mulf %161, %159 : vector<8x128xf32>
    %163 = arith.mulf %152, %138 : vector<8x128xf32>
    %164 = arith.addf %162, %163 : vector<8x128xf32>
    %c48 = arith.constant 48 : index
    %c0_47 = arith.constant 0 : index
    %165 = vector.load %arg6[%c48, %c0_47] : memref<64x384xf32, #tpu.memory_space<vmem>>, vector<8x384xf32>
    %166 = arith.truncf %164 : vector<8x128xf32> to vector<8x128xbf16>
    %c0_48 = arith.constant 0 : index
    %c0_49 = arith.constant 0 : index
    %167 = vector.load %arg2[%c0_48, %c0_49] : memref<128x384xbf16, #tpu.memory_space<vmem>>, vector<128x384xbf16>
    %cst_50 = arith.constant dense<0.000000e+00> : vector<8x384xf32>
    %168 = tpu.matmul %166, %167, %cst_50 {dimension_numbers = #tpu.dot_dimension_numbers<[1], [0], [0], [1], [0, 0, 1, 1], [], []>} : vector<8x128xbf16>, vector<128x384xbf16>, vector<8x384xf32> -> vector<8x384xf32>
    %169 = vector.extract_strided_slice %165 {offsets = [0, 0], sizes = [8, 256], strides = [1, 1]} : vector<8x384xf32> to vector<8x256xf32>
    %170 = vector.extract_strided_slice %168 {offsets = [0, 0], sizes = [8, 256], strides = [1, 1]} : vector<8x384xf32> to vector<8x256xf32>
    %171 = arith.addf %169, %170 : vector<8x256xf32>
    %172 = arith.negf %171 : vector<8x256xf32>
    %173 = math.exp %172 : vector<8x256xf32>
    %cst_51 = arith.constant 1.000000e+00 : f32
    %174 = vector.broadcast %cst_51 : f32 to vector<8x256xf32>
    %175 = arith.addf %174, %173 : vector<8x256xf32>
    %176 = arith.divf %174, %175 : vector<8x256xf32>
    %177 = vector.extract_strided_slice %176 {offsets = [0, 0], sizes = [8, 128], strides = [1, 1]} : vector<8x256xf32> to vector<8x128xf32>
    %178 = vector.extract_strided_slice %176 {offsets = [0, 128], sizes = [8, 128], strides = [1, 1]} : vector<8x256xf32> to vector<8x128xf32>
    %179 = vector.extract_strided_slice %165 {offsets = [0, 256], sizes = [8, 128], strides = [1, 1]} : vector<8x384xf32> to vector<8x128xf32>
    %180 = vector.extract_strided_slice %168 {offsets = [0, 256], sizes = [8, 128], strides = [1, 1]} : vector<8x384xf32> to vector<8x128xf32>
    %181 = vector.broadcast %7 : vector<1x128xf32> to vector<8x128xf32>
    %182 = arith.addf %180, %181 : vector<8x128xf32>
    %183 = arith.mulf %177, %182 : vector<8x128xf32>
    %184 = arith.addf %179, %183 : vector<8x128xf32>
    %185 = math.tanh %184 : vector<8x128xf32>
    %cst_52 = arith.constant 1.000000e+00 : f32
    %186 = vector.broadcast %cst_52 : f32 to vector<8x128xf32>
    %187 = arith.subf %186, %178 : vector<8x128xf32>
    %188 = arith.mulf %187, %185 : vector<8x128xf32>
    %189 = arith.mulf %178, %164 : vector<8x128xf32>
    %190 = arith.addf %188, %189 : vector<8x128xf32>
    %c56 = arith.constant 56 : index
    %c0_53 = arith.constant 0 : index
    %191 = vector.load %arg6[%c56, %c0_53] : memref<64x384xf32, #tpu.memory_space<vmem>>, vector<8x384xf32>
    %192 = arith.truncf %190 : vector<8x128xf32> to vector<8x128xbf16>
    %c0_54 = arith.constant 0 : index
    %c0_55 = arith.constant 0 : index
    %193 = vector.load %arg2[%c0_54, %c0_55] : memref<128x384xbf16, #tpu.memory_space<vmem>>, vector<128x384xbf16>
    %cst_56 = arith.constant dense<0.000000e+00> : vector<8x384xf32>
    %194 = tpu.matmul %192, %193, %cst_56 {dimension_numbers = #tpu.dot_dimension_numbers<[1], [0], [0], [1], [0, 0, 1, 1], [], []>} : vector<8x128xbf16>, vector<128x384xbf16>, vector<8x384xf32> -> vector<8x384xf32>
    %195 = vector.extract_strided_slice %191 {offsets = [0, 0], sizes = [8, 256], strides = [1, 1]} : vector<8x384xf32> to vector<8x256xf32>
    %196 = vector.extract_strided_slice %194 {offsets = [0, 0], sizes = [8, 256], strides = [1, 1]} : vector<8x384xf32> to vector<8x256xf32>
    %197 = arith.addf %195, %196 : vector<8x256xf32>
    %198 = arith.negf %197 : vector<8x256xf32>
    %199 = math.exp %198 : vector<8x256xf32>
    %cst_57 = arith.constant 1.000000e+00 : f32
    %200 = vector.broadcast %cst_57 : f32 to vector<8x256xf32>
    %201 = arith.addf %200, %199 : vector<8x256xf32>
    %202 = arith.divf %200, %201 : vector<8x256xf32>
    %203 = vector.extract_strided_slice %202 {offsets = [0, 0], sizes = [8, 128], strides = [1, 1]} : vector<8x256xf32> to vector<8x128xf32>
    %204 = vector.extract_strided_slice %202 {offsets = [0, 128], sizes = [8, 128], strides = [1, 1]} : vector<8x256xf32> to vector<8x128xf32>
    %205 = vector.extract_strided_slice %191 {offsets = [0, 256], sizes = [8, 128], strides = [1, 1]} : vector<8x384xf32> to vector<8x128xf32>
    %206 = vector.extract_strided_slice %194 {offsets = [0, 256], sizes = [8, 128], strides = [1, 1]} : vector<8x384xf32> to vector<8x128xf32>
    %207 = vector.broadcast %7 : vector<1x128xf32> to vector<8x128xf32>
    %208 = arith.addf %206, %207 : vector<8x128xf32>
    %209 = arith.mulf %203, %208 : vector<8x128xf32>
    %210 = arith.addf %205, %209 : vector<8x128xf32>
    %211 = math.tanh %210 : vector<8x128xf32>
    %cst_58 = arith.constant 1.000000e+00 : f32
    %212 = vector.broadcast %cst_58 : f32 to vector<8x128xf32>
    %213 = arith.subf %212, %204 : vector<8x128xf32>
    %214 = arith.mulf %213, %211 : vector<8x128xf32>
    %215 = arith.mulf %204, %190 : vector<8x128xf32>
    %216 = arith.addf %214, %215 : vector<8x128xf32>
    %c0_59 = arith.constant 0 : index
    %c0_60 = arith.constant 0 : index
    %217 = vector.load %arg5[%c0_59, %c0_60] : memref<8x128xf32, #tpu.memory_space<vmem>>, vector<8x128xf32>
    tpu.vector_store %arg5[%c0_59, %c0_60], %216 {strides = array<i32>} : memref<8x128xf32, #tpu.memory_space<vmem>>, vector<8x128xf32>,
    return
  }
}

</mosaic_0001>

<bundles_post_ra>
// kernel: motion_gru_s1_forward.1
= control target key start
LH: loop header
LB: loop body
LE: loop exit
PB: predicated region body
PF: predicated region fallthrough
CT: control target
= control target key end

     0   :  { %vm98_vm0 = vcmask 261120   ;;  %s2055_s0 = inlined_call_operand.vmem [shape: bf16[64,32], index: 0, kind: input, shape index: {}]   ;;  %s2056_s1 = inlined_call_operand.vmem [shape: bf16[32,384], index: 1, kind: input, shape index: {}]   ;;  %s2057_s2 = inlined_call_operand.vmem [shape: bf16[128,384], index: 2, kind: input, shape index: {}]   ;;  %s2058_s3 = inlined_call_operand.vmem [shape: f32[1,384], index: 3, kind: input, shape index: {}]   ;;  %s2059_s4 = inlined_call_operand.vmem [shape: f32[1,128], index: 4, kind: input, shape index: {}]   ;;  %s2060_s5 = inlined_call_operand.hbm [shape: f32[8,128], index: 5, kind: output, shape index: {}]  }
   0x1   :  { %v1160_v0 = vld [vmem:[%s2056_s1 + $0x18] sm:$0xf]  ;;  %v1302_v1 = vld [vmem:[%s2056_s1 + $0x20] sm:$0xf0]  ;;  %v1268_v2 = vld [vmem:[%s2057_s2 + $0xa8] sm:$0xf] }
   0x2   :  { %v1161_v3 = vor.u32 %v1302_v1, %v1160_v0  ;;  %v1326_v4 = vld [vmem:[%s2057_s2 + $0xb0] sm:$0xf0]  ;;  %v1148_v5 = vld [vmem:[%s2056_s1] sm:$0xf]  ;;  %v1299_v6 = vld [vmem:[%s2056_s1 + $0x8] sm:$0xf0] }
   0x3   :  { %v1488_v7 = vor.u32 %v1326_v4, %v1268_v2  ;;  %v1256_v8 = vld [vmem:[%s2057_s2 + $0x90] sm:$0xf]  ;;  %v1323_v9 = vld [vmem:[%s2057_s2 + $0x98] sm:$0xf0]  ;;  %v1149_v10 = vor.u32 %v1299_v6, %v1148_v5  ;;  %v1244_v12 = vld [vmem:[%s2057_s2 + $0x78] sm:$0xf] }
   0x4   :  { %117 = vmatpush.bf16.msra.mxu0 %v1161_v3  ;;  %v1497_v11 = vor.u32 %v1323_v9, %v1256_v8  ;;  %v1320_v13 = vld [vmem:[%s2057_s2 + $0x80] sm:$0xf0]  ;;  %v1276_v14 = vld [vmem:[%s2057_s2 + $0xb0] sm:$0xf]  ;;  %v1327_v16 = vld [vmem:[%s2057_s2 + $0xb8] sm:$0xf0] }
   0x5   :  { %386 = vmatpush.bf16.msra.mxu3 %v1488_v7  ;;  %v1511_v15 = vld [vmem:[%s2055_s0] sm:$0xff]  ;;  %v1516_v17 = vor.u32 %v1327_v16, %v1276_v14  ;;  %v1519_v18 = vor.u32 %v1320_v13, %v1244_v12  ;;  %v1264_v19 = vld [vmem:[%s2057_s2 + $0x98] sm:$0xf]  ;;  %v1317_v21 = vld [vmem:[%s2057_s2 + $0x68] sm:$0xf0] }
   0x6   :  { %v1232_v20 = vld [vmem:[%s2057_s2 + $0x60] sm:$0xf]  ;;  %v1324_v22 = vld [vmem:[%s2057_s2 + $0xa0] sm:$0xf0]  ;;  %v1321_v25 = vld [vmem:[%s2057_s2 + $0x88] sm:$0xf0] }
   0x7   :  { %v1536_v23 = vor.u32 %v1324_v22, %v1264_v19  ;;  %v1252_v24 = vld [vmem:[%s2057_s2 + $0x80] sm:$0xf]  ;;  %v1545_v26 = vor.u32 %v1317_v21, %v1232_v20 }
   0x8   :  { %118 = vmatpush.bf16.msra.mxu0 %v1149_v10 }
   0x9   :  { %387 = vmatpush.bf16.msra.mxu3 %v1497_v11 }
   0xb   :  { %1170 = vmatmul.msk.bf16.vlgmr.msra.gmra.mxu0 %vm98_vm0, %v1511_v15 }
   0xc   :  { %412 = vmatpush.bf16.msrb.mxu0 %v1516_v17 }
   0xd   :  { %388 = vmatpush.bf16.msra.mxu3 %v1519_v18 }
   0xe   :  { %10 = vsyncpa [#allocation4], 0  ;;  %v1220_v27 = vld [vmem:[%s2057_s2 + $0x48] sm:$0xf]  ;;  %v1314_v28 = vld [vmem:[%s2057_s2 + $0x50] sm:$0xf0]  ;;  %v1554_v29 = vor.u32 %v1321_v25, %v1252_v24 }
   0xf   :  { %v1557_v30 = vor.u32 %v1314_v28, %v1220_v27  ;;  %v1208_v31 = vld [vmem:[%s2057_s2 + $0x30] sm:$0xf]  ;;  %v1311_v32 = vld [vmem:[%s2057_s2 + $0x38] sm:$0xf0]  ;;  %v1240_v33 = vld [vmem:[%s2057_s2 + $0x68] sm:$0xf] }
  0x10   :  { %413 = vmatpush.bf16.msrb.mxu0 %v1536_v23  ;;  %v1318_v34 = vld [vmem:[%s2057_s2 + $0x70] sm:$0xf0]  ;;  %v1301_v35 = vld [vmem:[%s2056_s1 + $0x1c] sm:$0xf]  ;;  %v1162_v37 = vld [vmem:[%s2056_s1 + $0x24] sm:$0xf0]  ;;  %v1581_v39 = vor.u32 %v1311_v32, %v1208_v31 }
  0x11   :  { %389 = vmatpush.bf16.msra.mxu3 %v1545_v26  ;;  %v1575_v36 = vor.u32 %v1318_v34, %v1240_v33  ;;  %v1165_v38 = vor.u32 %v1301_v35, %v1162_v37  ;;  %v1196_v40 = vld [vmem:[%s2057_s2 + $0x18] sm:$0xf]  ;;  %v1308_v41 = vld [vmem:[%s2057_s2 + $0x20] sm:$0xf0]  ;;  %v1150_v43 = vld [vmem:[%s2056_s1 + $0xc] sm:$0xf0] }
  0x12   :  { %v1298_v42 = vld [vmem:[%s2056_s1 + $0x4] sm:$0xf]  ;;  %v1599_v44 = vld [vmem:[%s2055_s0 + $0x8] sm:$0xff]  ;;  %v1602_v46 = vor.u32 %v1308_v41, %v1196_v40  ;;  %v1184_v47 = vld [vmem:[%s2057_s2] sm:$0xf]  ;;  %v1438_v13 = vmov 0  }
  0x13   :  { %146 = vmatpush.bf16.msra.mxu1 %v1165_v38  ;;  %v1153_v45 = vor.u32 %v1298_v42, %v1150_v43  ;;  %v1305_v48 = vld [vmem:[%s2057_s2 + $0x8] sm:$0xf0]  ;;  %v1228_v49 = vld [vmem:[%s2057_s2 + $0x50] sm:$0xf]  ;;  %v1315_v50 = vld [vmem:[%s2057_s2 + $0x58] sm:$0xf0] }
  0x14   :  { %414 = vmatpush.bf16.msrb.mxu0 %v1554_v29  ;;  %v1325_v51 = vld [vmem:[%s2057_s2 + $0xac] sm:$0xf]  ;;  %v1270_v52 = vld [vmem:[%s2057_s2 + $0xb4] sm:$0xf0]  ;;  %v1624_v53 = vor.u32 %v1315_v50, %v1228_v49  ;;  %v1628_v54 = vor.u32 %v1305_v48, %v1184_v47  ;;  %v1168_v56 = vld [vmem:[%s2056_s1 + $0x20] sm:$0xf] }
  0x15   :  { %390 = vmatpush.bf16.msra.mxu3 %v1557_v30  ;;  %v1631_v55 = vor.u32 %v1325_v51, %v1270_v52  ;;  %v1303_v57 = vld [vmem:[%s2056_s1 + $0x28] sm:$0xf0]  ;;  %v1216_v58 = vld [vmem:[%s2057_s2 + $0x38] sm:$0xf]  ;;  %v1322_v59 = vld [vmem:[%s2057_s2 + $0x94] sm:$0xf] }
  0x16   :  { %v1258_v60 = vld [vmem:[%s2057_s2 + $0x9c] sm:$0xf0]  ;;  %v1169_v61 = vor.u32 %v1303_v57, %v1168_v56  ;;  %v1312_v62 = vld [vmem:[%s2057_s2 + $0x40] sm:$0xf0]  ;;  %v1156_v0 = vld [vmem:[%s2056_s1 + $0x8] sm:$0xf] }
  0x17   :  { %147 = vmatpush.bf16.msra.mxu1 %v1153_v45  ;;  %v1654_v63 = vor.u32 %v1312_v62, %v1216_v58  ;;  %v1300_v1 = vld [vmem:[%s2056_s1 + $0x10] sm:$0xf0]  ;;  %v1204_v2 = vld [vmem:[%s2057_s2 + $0x20] sm:$0xf]  ;;  %v1667_v3 = vor.u32 %v1322_v59, %v1258_v60  ;;  %v1319_v4 = vld [vmem:[%s2057_s2 + $0x7c] sm:$0xf] }
  0x18   :  { %415 = vmatpush.bf16.msrb.mxu0 %v1575_v36  ;;  %175 = vmatpush.bf16.msra.mxu2 %v1169_v61  ;;  %v1157_v5 = vor.u32 %v1300_v1, %v1156_v0  ;;  %v1309_v6 = vld [vmem:[%s2057_s2 + $0x28] sm:$0xf0]  ;;  %v1246_v8 = vld [vmem:[%s2057_s2 + $0x84] sm:$0xf0]  ;;  %v1306_v12 = vld [vmem:[%s2057_s2 + $0x10] sm:$0xf0] }
  0x19   :  { %391 = vmatpush.bf16.msra.mxu3 %v1581_v39  ;;  %v1679_v9 = vor.u32 %v1309_v6, %v1204_v2  ;;  %v1192_v10 = vld [vmem:[%s2057_s2 + $0x8] sm:$0xf]  ;;  %v1690_v14 = vor.u32 %v1319_v4, %v1246_v8  ;;  %v1296_v19 = vld [vmem:[%s2055_s0 + $0x10] sm:$0xff]  ;;  %v1316_v20 = vld [vmem:[%s2057_s2 + $0x64] sm:$0xf]  ;;  %s1121_s25 = sshll.u32 %s2060_s5, 4  ;;  %s1122_s25 = int_to_ptr.hbm [resolvable:$true] %s1121_s25 }
  0x1a   :  { %1174 = vmatmul.msk.bf16.vlgmr.msra.gmra.mxu1 %vm98_vm0, %v1511_v15  ;;  %v1693_v16 = vor.u32 %v1306_v12, %v1192_v10  ;;  %v1234_v21 = vld [vmem:[%s2057_s2 + $0x6c] sm:$0xf0]  ;;  %v1313_v24 = vld [vmem:[%s2057_s2 + $0x4c] sm:$0xf]  ;;  %v1222_v25 = vld [vmem:[%s2057_s2 + $0x54] sm:$0xf0] }
  0x1b   :  { %1171 = vmatmul.msk.bf16.gmra.mxu0 %vm98_vm0, %v1599_v44  ;;  %480 = vmatpush.bf16.msrb.mxu1 %v1488_v7  ;;  %v1709_v22 = vor.u32 %v1316_v20, %v1234_v21  ;;  %v1310_v27 = vld [vmem:[%s2057_s2 + $0x34] sm:$0xf]  ;;  %v1210_v28 = vld [vmem:[%s2057_s2 + $0x3c] sm:$0xf0]  ;;  %v1307_v32 = vld [vmem:[%s2057_s2 + $0x1c] sm:$0xf] }
  0x1c   :  { %416 = vmatpush.bf16.msrb.mxu0 %v1624_v53  ;;  %176 = vmatpush.bf16.msra.mxu2 %v1157_v5  ;;  %v1737_v31 = vor.u32 %v1310_v27, %v1210_v28  ;;  %v1198_v33 = vld [vmem:[%s2057_s2 + $0x24] sm:$0xf0]  ;;  %v1297_v35 = vld [vmem:[%s2055_s0 + $0x18] sm:$0xff]  ;;  %v1304_v37 = vld [vmem:[%s2057_s2 + $0x4] sm:$0xf] }
  0x1d   :  { %392 = vmatpush.bf16.msra.mxu3 %v1602_v46  ;;  %v1749_v34 = vor.u32 %v1307_v32, %v1198_v33  ;;  %v1186_v38 = vld [vmem:[%s2057_s2 + $0xc] sm:$0xf0]  ;;  %v38_v42 = vld [vmem:[%s2058_s3] sm:$0x7] }
  0x1e   :  { %v1767_v40 = vor.u32 %v1304_v37, %v1186_v38  ;;  %v40_v43 = vperm.slane %v38_v42, 0  ;;  %v1838_v5 = vperm.slane %v38_v42, 1 }
  0x1f   :  { %481 = vmatpush.bf16.msrb.mxu1 %v1497_v11  ;;  %1178 = vmatmul.msk.bf16.vlgmr.msra.gmra.mxu2 %vm98_vm0, %v1511_v15  ;;  %v1723_v15 = vor.u32 %v1313_v24, %v1222_v25 }
  0x20   :  { %417 = vmatpush.bf16.msrb.mxu0 %v1654_v63  ;;  %493 = vmatpush.bf16.msrb.mxu2 %v1631_v55 }
  0x21   :  { %393 = vmatpush.bf16.msra.mxu3 %v1628_v54 }
  0x23   :  { %482 = vmatpush.bf16.msrb.mxu1 %v1519_v18 }
  0x24   :  { %394 = vmatmul.bf16.vlgmr.msra.gmra.mxu3 %v1438_v13  ;;  %418 = vmatpush.bf16.msrb.mxu0 %v1679_v9 }
  0x25   :  { %399 = vmatpush.bf16.msrb.mxu3 %v1631_v55  ;;  %494 = vmatpush.bf16.msrb.mxu2 %v1667_v3 }
  0x27   :  { %483 = vmatpush.bf16.msrb.mxu1 %v1545_v26 }
  0x28   :  { %419 = vmatpush.bf16.msrb.mxu0 %v1693_v16 }
  0x29   :  { %400 = vmatpush.bf16.msrb.mxu3 %v1667_v3  ;;  %495 = vmatpush.bf16.msrb.mxu2 %v1690_v14 }
  0x2a   :  { %1175 = vmatmul.msk.bf16.gmra.mxu1 %vm98_vm0, %v1599_v44 }
  0x2b   :  { %1172 = vmatmul.msk.bf16.gmra.mxu0 %vm98_vm0, %v1296_v19  ;;  %484 = vmatpush.bf16.msrb.mxu1 %v1557_v30 }
  0x2c   :  { %571 = vmatpush.bf16.msra.mxu0 %v1488_v7 }
  0x2d   :  { %401 = vmatpush.bf16.msrb.mxu3 %v1690_v14  ;;  %496 = vmatpush.bf16.msrb.mxu2 %v1709_v22 }
  0x2f   :  { %485 = vmatpush.bf16.msrb.mxu1 %v1581_v39  ;;  %1179 = vmatmul.msk.bf16.gmra.mxu2 %vm98_vm0, %v1599_v44 }
  0x30   :  { %572 = vmatpush.bf16.msra.mxu0 %v1497_v11 }
  0x31   :  { %402 = vmatpush.bf16.msrb.mxu3 %v1709_v22  ;;  %497 = vmatpush.bf16.msrb.mxu2 %v1723_v15 }
  0x33   :  { %486 = vmatpush.bf16.msrb.mxu1 %v1602_v46 }
  0x34   :  { %573 = vmatpush.bf16.msra.mxu0 %v1519_v18 }
  0x35   :  { %403 = vmatpush.bf16.msrb.mxu3 %v1723_v15  ;;  %498 = vmatpush.bf16.msrb.mxu2 %v1737_v31 }
  0x37   :  { %487 = vmatpush.bf16.msrb.mxu1 %v1628_v54 }
  0x38   :  { %574 = vmatpush.bf16.msra.mxu0 %v1545_v26 }
  0x39   :  { %404 = vmatpush.bf16.msrb.mxu3 %v1737_v31  ;;  %499 = vmatpush.bf16.msrb.mxu2 %v1749_v34 }
  0x3a   :  { %1176 = vmatmul.msk.bf16.gmra.mxu1 %vm98_vm0, %v1296_v19 }
  0x3b   :  { %584 = vmatpush.bf16.msra.mxu1 %v1631_v55  ;;  %1173 = vmatmul.msk.bf16.gmra.mxu0 %vm98_vm0, %v1297_v35 }
  0x3c   :  { %575 = vmatpush.bf16.msra.mxu0 %v1557_v30 }
  0x3d   :  { %405 = vmatpush.bf16.msrb.mxu3 %v1749_v34  ;;  %500 = vmatpush.bf16.msrb.mxu2 %v1767_v40 }
  0x3f   :  { %585 = vmatpush.bf16.msra.mxu1 %v1667_v3  ;;  %1180 = vmatmul.msk.bf16.gmra.mxu2 %vm98_vm0, %v1296_v19 }
  0x40   :  { %576 = vmatpush.bf16.msra.mxu0 %v1581_v39 }
  0x41   :  { %406 = vmatpush.bf16.msrb.mxu3 %v1767_v40  ;;  %597 = vmatpush.bf16.msra.mxu2 %v1516_v17 }
  0x43   :  { %586 = vmatpush.bf16.msra.mxu1 %v1690_v14 }
  0x44   :  { %407 = vmatmul.bf16.vlgmr.msrb.gmra.mxu3 %v1438_v13  ;;  %577 = vmatpush.bf16.msra.mxu0 %v1602_v46 }
  0x45   :  { %506 = vmatpush.bf16.msra.mxu3 %v1516_v17  ;;  %598 = vmatpush.bf16.msra.mxu2 %v1536_v23 }
  0x47   :  { %587 = vmatpush.bf16.msra.mxu1 %v1709_v22 }
  0x48   :  { %578 = vmatpush.bf16.msra.mxu0 %v1628_v54 }
  0x49   :  { %507 = vmatpush.bf16.msra.mxu3 %v1536_v23  ;;  %599 = vmatpush.bf16.msra.mxu2 %v1554_v29 }
  0x4a   :  { %1177 = vmatmul.msk.bf16.gmra.mxu1 %vm98_vm0, %v1297_v35 }
  0x4b   :  { %588 = vmatpush.bf16.msra.mxu1 %v1723_v15  ;;  %420 = vmatmul.bf16.vlgmr.msrb.gmra.mxu0 %v1438_v13 }
  0x4c   :  { %675 = vmatpush.bf16.msrb.mxu0 %v1631_v55 }
  0x4d   :  { %508 = vmatpush.bf16.msra.mxu3 %v1554_v29  ;;  %600 = vmatpush.bf16.msra.mxu2 %v1575_v36 }
  0x4f   :  { %589 = vmatpush.bf16.msra.mxu1 %v1737_v31  ;;  %1181 = vmatmul.msk.bf16.gmra.mxu2 %vm98_vm0, %v1297_v35  ;;  %v1846_v35 = vld [vmem:[%s2059_s4] ss:$0 sm:$0xff] }
  0x50   :  { %676 = vmatpush.bf16.msrb.mxu0 %v1667_v3 }
  0x51   :  { %509 = vmatpush.bf16.msra.mxu3 %v1575_v36  ;;  %601 = vmatpush.bf16.msra.mxu2 %v1624_v53 }
  0x53   :  { %590 = vmatpush.bf16.msra.mxu1 %v1749_v34 }
  0x54   :  { %677 = vmatpush.bf16.msrb.mxu0 %v1690_v14 }
  0x55   :  { %510 = vmatpush.bf16.msra.mxu3 %v1624_v53  ;;  %602 = vmatpush.bf16.msra.mxu2 %v1654_v63 }
  0x57   :  { %591 = vmatpush.bf16.msra.mxu1 %v1767_v40 }
  0x58   :  { %678 = vmatpush.bf16.msrb.mxu0 %v1709_v22 }
  0x59   :  { %511 = vmatpush.bf16.msra.mxu3 %v1654_v63  ;;  %603 = vmatpush.bf16.msra.mxu2 %v1679_v9 }
  0x5c   :  { %679 = vmatpush.bf16.msrb.mxu0 %v1723_v15 }
  0x5d   :  { %512 = vmatpush.bf16.msra.mxu3 %v1679_v9  ;;  %604 = vmatpush.bf16.msra.mxu2 %v1693_v16 }
  0x60   :  { %680 = vmatpush.bf16.msrb.mxu0 %v1737_v31 }
  0x61   :  { %513 = vmatpush.bf16.msra.mxu3 %v1693_v16 }
  0x64   :  { %681 = vmatpush.bf16.msrb.mxu0 %v1749_v34 }
  0x65   :  { %662 = vmatpush.bf16.msrb.mxu3 %v1488_v7 }
  0x68   :  { %682 = vmatpush.bf16.msrb.mxu0 %v1767_v40 }
  0x69   :  { %663 = vmatpush.bf16.msrb.mxu3 %v1497_v11 }
  0x6d   :  { %664 = vmatpush.bf16.msrb.mxu3 %v1519_v18 }
  0x71   :  { %665 = vmatpush.bf16.msrb.mxu3 %v1545_v26 }
  0x75   :  { %666 = vmatpush.bf16.msrb.mxu3 %v1557_v30 }
  0x79   :  { %667 = vmatpush.bf16.msrb.mxu3 %v1581_v39 }
  0x7d   :  { %668 = vmatpush.bf16.msrb.mxu3 %v1602_v46 }
  0x81   :  { %669 = vmatpush.bf16.msrb.mxu3 %v1628_v54 }
  0x88   :  { %v120_v41 = vpop.f32.mrf.mxu0 }
  0x89   :  { %v121_v51 = vadd.f32 %v120_v41, %v40_v43 }
  0x90   :  { %v122_v44 = vpop.f32.mrf.mxu0 }
  0x91   :  { %v1826_v45 = vadd.f32 %v122_v44, %v40_v43 }
  0x97   :  { %v149_v8 = vpop.f32.mrf.mxu1 }
  0x98   :  { %v125_v47 = vpop.f32.mrf.mxu0  ;;  %v150_v12 = vadd.f32 %v149_v8, %v1838_v5 }
  0x99   :  { %v1828_v48 = vadd.f32 %v125_v47, %v40_v43 }
  0xa0   :  { %v127_v49 = vpop.f32.mrf.mxu0 }
  0xa1   :  { %v1830_v50 = vadd.f32 %v127_v49, %v40_v43 }
  0xa7   :  { %v395_v52 = vpop.f32.mrf.mxu3 }
  0xa8   :  { %v425_v56 = vadd.f32 %v395_v52, %v121_v51  ;;  %v130_v57 = vpop.f32.mrf.mxu0  ;;  %v1849_v51 = vperm.slane %v38_v42, 2 }
  0xa9   :  { %v1832_v58 = vadd.f32 %v130_v57, %v40_v43 }
  0xaa   :  { %v1278_v59 = vmul.f32 -1.442695, %v425_v56  ;;  %v178_v56 = vpop.f32.mrf.mxu2 }
  0xac   :  { %1331 = vpow2.f32 %v1278_v59 }
  0xaf   :  { %v397_v60 = vpop.f32.mrf.mxu3 }
  0xb0   :  { %v132_v61 = vpop.f32.mrf.mxu0  ;;  %v179_v60 = vadd.f32 %v178_v56, %v1849_v51 }
  0xb1   :  { %v1834_v62 = vadd.f32 %v132_v61, %v40_v43 }
  0xb2   :  { %v1332_v0 = vpop.eup %1331 }
  0xb3   :  { %v433_v1 = vadd.f32 1.0, %v1332_v0 }
  0xb5   :  { %1333 = vrcp.f32 %v433_v1  ;;  %v446_v38 = vand.u32 2147483648, %v433_v1  ;;  %vm440_vm2 = vweird.f32 %v433_v1 }
  0xb7   :  { %v447_v52 = vor.u32 1.1754944e-38, %v446_v38 }
  0xb8   :  { %v135_v2 = vpop.f32.mrf.mxu0 }
  0xb9   :  { %v1836_v4 = vadd.f32 %v135_v2, %v40_v43 }
  0xbb   :  { %2061 = vst [vmem:[#allocation6_spill] sm:$0xff] %v1836_v4  ;;  %v1334_v6 = vpop.eup %1333 }
  0xbc   :  { %v436_v19 = vmul.f32 %v1334_v6, %v433_v1  ;;  %vm441_vm1 = vweird.f32 %v1334_v6 }
  0xbd   :  { %vm442_vm3 = vmor %vm440_vm2, %vm441_vm1 }
  0xbe   :  { %v437_v24 = vsub.f32 1.0, %v436_v19 }
  0xc0   :  { %v137_v10 = vpop.f32.mrf.mxu0  ;;  %v438_v28 = vmul.f32 %v1334_v6, %v437_v24 }
  0xc1   :  { %v1841_v13 = vadd.f32 %v137_v10, %v40_v43  ;;  %v444_v43 = vand.u32 2147483647, %v433_v1 }
  0xc2   :  { %v439_v33 = vadd.f32 %v1334_v6, %v438_v28 }
  0xc3   :  { %2062 = vst [vmem:[#allocation7_spill] sm:$0xff] %v1841_v13  ;;  %vm445_vm4 = vcmp.eq.f32.partialorder %v444_v43, 8.507059e+37 }
  0xc4   :  { %v443_v47 = vsel %vm442_vm3, %v1334_v6, %v439_v33  ;;  %v151_v33 = vpop.f32.mrf.mxu1 }
  0xc5   :  { %v448_v57 = vsel %vm445_vm4, %v447_v52, %v443_v47 }
  0xc7   :  { %v408_v20 = vpop.f32.mrf.mxu3 }
  0xc8   :  { %v426_v21 = vadd.f32 %v408_v20, %v150_v12  ;;  %v421_v27 = vpop.f32.mrf.mxu0 }
  0xc9   :  { %v468_v49 = vadd.f32 %v1846_v35, %v421_v27 }
  0xca   :  { %v1279_v25 = vmul.f32 -1.442695, %v426_v21 }
  0xcb   :  { %v469_v59 = vmul.f32 %v468_v49, %v448_v57 }
  0xcc   :  { %1335 = vpow2.f32 %v1279_v25  ;;  %v1880_v38 = vpop.f32.mrf.mxu1 }
  0xcd   :  { %v470_v2 = vadd.f32 %v469_v59, %v179_v60 }
  0xcf   :  { %v410_v32 = vpop.f32.mrf.mxu3 }
  0xd0   :  { %v423_v44 = vpop.f32.mrf.mxu0 }
  0xd2   :  { %v1336_v37 = vpop.eup %1335 }
  0xd3   :  { %v434_v41 = vadd.f32 1.0, %v1336_v37  ;;  %v180_v37 = vpop.f32.mrf.mxu2 }
  0xd4   :  { %v1884_v43 = vpop.f32.mrf.mxu1 }
  0xd5   :  { %1337 = vrcp.f32 %v434_v41  ;;  %v461_v1 = vand.u32 2147483648, %v434_v41  ;;  %v459_v12 = vand.u32 2147483647, %v434_v41  ;;  %vm455_vm6 = vweird.f32 %v434_v41 }
  0xd6   :  { %1339 = vtanh.f32 %v470_v2 }
  0xd7   :  { %v462_v42 = vor.u32 1.1754944e-38, %v461_v1  ;;  %vm460_vm8 = vcmp.eq.f32.partialorder %v459_v12, 8.507059e+37  ;;  %v152_v1 = vadd.f32 %v151_v33, %v1838_v5 }
  0xdb   :  { %v1338_v61 = vpop.eup %1337 }
  0xdc   :  { %v451_v0 = vmul.f32 %v1338_v61, %v434_v41  ;;  %vm456_vm5 = vweird.f32 %v1338_v61  ;;  %v1340_v24 = vpop.eup %1339  ;;  %v1882_v41 = vpop.f32.mrf.mxu2 }
  0xdd   :  { %vm457_vm7 = vmor %vm455_vm6, %vm456_vm5  ;;  %v1888_v47 = vpop.f32.mrf.mxu1 }
  0xde   :  { %v452_v8 = vsub.f32 1.0, %v451_v0 }
  0xe0   :  { %v453_v10 = vmul.f32 %v1338_v61, %v452_v8 }
  0xe2   :  { %v454_v6 = vadd.f32 %v1338_v61, %v453_v10 }
  0xe4   :  { %v458_v19 = vsel %vm457_vm7, %v1338_v61, %v454_v6  ;;  %v1886_v44 = vpop.f32.mrf.mxu2 }
  0xe5   :  { %v463_v20 = vsel %vm460_vm8, %v462_v42, %v458_v19  ;;  %v1892_v52 = vpop.f32.mrf.mxu1 }
  0xe6   :  { %v472_v21 = vsub.f32 1.0, %v463_v20  ;;  %v474_v27 = vmul.f32 0.0, %v463_v20 }
  0xe8   :  { %v473_v25 = vmul.f32 %v1340_v24, %v472_v21 }
  0xea   :  { %v1852_v28 = vadd.f32 %v474_v27, %v473_v25 }
  0xec   :  { %v479_v32 = vpack.c.bf16 %v1852_v28, %v1852_v28  ;;  %v1890_v49 = vpop.f32.mrf.mxu2 }
  0xed   :  { %v1896_v57 = vpop.f32.mrf.mxu1 }
  0xee   :  { %488 = vmatmul.bf16.vlgmr.msrb.gmra.mxu1 %v479_v32  ;;  %501 = vmatmul.bf16.vlgmr.msrb.gmra.mxu2 %v479_v32 }
  0xef   :  { %514 = vmatmul.bf16.vlgmr.msra.gmra.mxu3 %v479_v32  ;;  %688 = vmatpush.bf16.msrb.mxu1 %v1516_v17 }
  0xf0   :  { %753 = vmatpush.bf16.msrb.mxu2 %v1488_v7  ;;  %766 = vmatpush.bf16.msra.mxu3 %v1631_v55 }
  0xf3   :  { %689 = vmatpush.bf16.msrb.mxu1 %v1536_v23 }
  0xf4   :  { %754 = vmatpush.bf16.msrb.mxu2 %v1497_v11  ;;  %767 = vmatpush.bf16.msra.mxu3 %v1667_v3  ;;  %v1894_v56 = vpop.f32.mrf.mxu2 }
  0xf5   :  { %v1900_v60 = vpop.f32.mrf.mxu1 }
  0xf6   :  { %2064 = vst [vmem:[#allocation9_spill] sm:$0xff] %v1900_v60 }
  0xf7   :  { %690 = vmatpush.bf16.msrb.mxu1 %v1554_v29 }
  0xf8   :  { %755 = vmatpush.bf16.msrb.mxu2 %v1519_v18  ;;  %768 = vmatpush.bf16.msra.mxu3 %v1690_v14 }
  0xfb   :  { %691 = vmatpush.bf16.msrb.mxu1 %v1575_v36 }
  0xfc   :  { %756 = vmatpush.bf16.msrb.mxu2 %v1545_v26  ;;  %769 = vmatpush.bf16.msra.mxu3 %v1709_v22  ;;  %v1898_v59 = vpop.f32.mrf.mxu2 }
  0xfd   :  { %2063 = vst [vmem:[#allocation8_spill] sm:$0xff] %v1898_v59 }
  0xff   :  { %692 = vmatpush.bf16.msrb.mxu1 %v1624_v53 }
 0x100   :  { %757 = vmatpush.bf16.msrb.mxu2 %v1557_v30  ;;  %770 = vmatpush.bf16.msra.mxu3 %v1723_v15 }
 0x103   :  { %693 = vmatpush.bf16.msrb.mxu1 %v1654_v63 }
 0x104   :  { %758 = vmatpush.bf16.msrb.mxu2 %v1581_v39  ;;  %771 = vmatpush.bf16.msra.mxu3 %v1737_v31  ;;  %v1902_v61 = vpop.f32.mrf.mxu2 }
 0x105   :  { %2065 = vst [vmem:[#allocation10_spill] sm:$0xff] %v1902_v61 }
 0x107   :  { %694 = vmatpush.bf16.msrb.mxu1 %v1679_v9 }
 0x108   :  { %759 = vmatpush.bf16.msrb.mxu2 %v1602_v46  ;;  %772 = vmatpush.bf16.msra.mxu3 %v1749_v34 }
 0x10b   :  { %695 = vmatpush.bf16.msrb.mxu1 %v1693_v16 }
 0x10c   :  { %760 = vmatpush.bf16.msrb.mxu2 %v1628_v54  ;;  %773 = vmatpush.bf16.msra.mxu3 %v1767_v40 }
 0x16b   :  { %v489_v0 = vpop.f32.mrf.mxu1 }
 0x16c   :  { %v519_v2 = vadd.f32 %v489_v0, %v1826_v45 }
 0x16e   :  { %v1280_v8 = vmul.f32 -1.442695, %v519_v2 }
 0x170   :  { %1341 = vpow2.f32 %v1280_v8 }
 0x171   :  { %v502_v10 = vpop.f32.mrf.mxu2 }
 0x172   :  { %v520_v12 = vadd.f32 %v502_v10, %v152_v1  ;;  %v515_v6 = vpop.f32.mrf.mxu3 }
 0x173   :  { %v491_v42 = vpop.f32.mrf.mxu1 }
 0x174   :  { %v1281_v19 = vmul.f32 -1.442695, %v520_v12 }
 0x176   :  { %v1342_v20 = vpop.eup %1341  ;;  %1343 = vpow2.f32 %v1281_v19 }
 0x177   :  { %v527_v21 = vadd.f32 1.0, %v1342_v20 }
 0x179   :  { %1345 = vrcp.f32 %v527_v21  ;;  %v504_v24 = vpop.f32.mrf.mxu2  ;;  %v540_v2 = vand.u32 2147483648, %v527_v21  ;;  %v538_v8 = vand.u32 2147483647, %v527_v21  ;;  %vm534_vm10 = vweird.f32 %v527_v21 }
 0x17a   :  { %v517_v25 = vpop.f32.mrf.mxu3  ;;  %v559_v24 = vadd.f32 %v1846_v35, %v515_v6 }
 0x17b   :  { %v541_v12 = vor.u32 1.1754944e-38, %v540_v2  ;;  %vm539_vm12 = vcmp.eq.f32.partialorder %v538_v8, 8.507059e+37  ;;  %v181_v25 = vadd.f32 %v180_v37, %v1849_v51 }
 0x17c   :  { %v1344_v27 = vpop.eup %1343 }
 0x17d   :  { %v528_v32 = vadd.f32 1.0, %v1344_v27 }
 0x17f   :  { %v1346_v61 = vpop.eup %1345  ;;  %1347 = vrcp.f32 %v528_v32  ;;  %v553_v60 = vand.u32 2147483647, %v528_v32  ;;  %vm549_vm14 = vweird.f32 %v528_v32 }
 0x180   :  { %v530_v45 = vmul.f32 %v1346_v61, %v527_v21  ;;  %vm535_vm9 = vweird.f32 %v1346_v61 }
 0x181   :  { %vm536_vm11 = vmor %vm534_vm10, %vm535_vm9  ;;  %vm554_vm0 = vcmp.eq.f32.partialorder %v553_v60, 8.507059e+37 }
 0x182   :  { %v531_v0 = vsub.f32 1.0, %v530_v45  ;;  %v555_v45 = vand.u32 2147483648, %v528_v32 }
 0x184   :  { %v532_v33 = vmul.f32 %v1346_v61, %v531_v0  ;;  %v556_v21 = vor.u32 1.1754944e-38, %v555_v45 }
 0x185   :  { %v1348_v1 = vpop.eup %1347 }
 0x186   :  { %v545_v10 = vmul.f32 %v1348_v1, %v528_v32  ;;  %v533_v42 = vadd.f32 %v1346_v61, %v532_v33  ;;  %vm550_vm13 = vweird.f32 %v1348_v1 }
 0x187   :  { %vm551_vm15 = vmor %vm549_vm14, %vm550_vm13 }
 0x188   :  { %v546_v19 = vsub.f32 1.0, %v545_v10  ;;  %v537_v20 = vsel %vm536_vm11, %v1346_v61, %v533_v42 }
 0x189   :  { %v542_v27 = vsel %vm539_vm12, %v541_v12, %v537_v20 }
 0x18a   :  { %v547_v13 = vmul.f32 %v1348_v1, %v546_v19  ;;  %v560_v0 = vmul.f32 %v559_v24, %v542_v27 }
 0x18c   :  { %v561_v59 = vadd.f32 %v560_v0, %v181_v25  ;;  %v548_v4 = vadd.f32 %v1348_v1, %v547_v13 }
 0x18e   :  { %1349 = vtanh.f32 %v561_v59  ;;  %v552_v2 = vsel %vm551_vm15, %v1348_v1, %v548_v4  ;;  %v155_v4 = vadd.f32 %v1880_v38, %v1838_v5 }
 0x18f   :  { %v557_v61 = vsel %vm554_vm0, %v556_v21, %v552_v2 }
 0x190   :  { %v563_v33 = vsub.f32 1.0, %v557_v61  ;;  %v565_v37 = vmul.f32 %v557_v61, %v1852_v28 }
 0x194   :  { %v1350_v8 = vpop.eup %1349 }
 0x195   :  { %v564_v6 = vmul.f32 %v1350_v8, %v563_v33 }
 0x197   :  { %v1909_v10 = vadd.f32 %v565_v37, %v564_v6 }
 0x199   :  { %v570_v42 = vpack.c.bf16 %v1909_v10, %v1909_v10 }
 0x19b   :  { %579 = vmatmul.bf16.vlgmr.msra.gmra.mxu0 %v570_v42  ;;  %592 = vmatmul.bf16.vlgmr.msra.gmra.mxu1 %v570_v42 }
 0x19c   :  { %605 = vmatmul.bf16.vlgmr.msra.gmra.mxu2 %v570_v42  ;;  %779 = vmatpush.bf16.msra.mxu0 %v1516_v17 }
 0x19d   :  { %844 = vmatpush.bf16.msra.mxu1 %v1488_v7  ;;  %857 = vmatpush.bf16.msra.mxu2 %v1631_v55 }
 0x1a0   :  { %780 = vmatpush.bf16.msra.mxu0 %v1536_v23 }
 0x1a1   :  { %845 = vmatpush.bf16.msra.mxu1 %v1497_v11  ;;  %858 = vmatpush.bf16.msra.mxu2 %v1667_v3 }
 0x1a4   :  { %781 = vmatpush.bf16.msra.mxu0 %v1554_v29 }
 0x1a5   :  { %846 = vmatpush.bf16.msra.mxu1 %v1519_v18  ;;  %859 = vmatpush.bf16.msra.mxu2 %v1690_v14 }
 0x1a8   :  { %782 = vmatpush.bf16.msra.mxu0 %v1575_v36 }
 0x1a9   :  { %847 = vmatpush.bf16.msra.mxu1 %v1545_v26  ;;  %860 = vmatpush.bf16.msra.mxu2 %v1709_v22 }
 0x1ac   :  { %783 = vmatpush.bf16.msra.mxu0 %v1624_v53 }
 0x1ad   :  { %848 = vmatpush.bf16.msra.mxu1 %v1557_v30  ;;  %861 = vmatpush.bf16.msra.mxu2 %v1723_v15 }
 0x1b0   :  { %784 = vmatpush.bf16.msra.mxu0 %v1654_v63 }
 0x1b1   :  { %849 = vmatpush.bf16.msra.mxu1 %v1581_v39  ;;  %862 = vmatpush.bf16.msra.mxu2 %v1737_v31 }
 0x1b4   :  { %785 = vmatpush.bf16.msra.mxu0 %v1679_v9 }
 0x1b5   :  { %850 = vmatpush.bf16.msra.mxu1 %v1602_v46  ;;  %863 = vmatpush.bf16.msra.mxu2 %v1749_v34 }
 0x1b8   :  { %786 = vmatpush.bf16.msra.mxu0 %v1693_v16 }
 0x1b9   :  { %851 = vmatpush.bf16.msra.mxu1 %v1628_v54  ;;  %864 = vmatpush.bf16.msra.mxu2 %v1767_v40 }
 0x218   :  { %v580_v13 = vpop.f32.mrf.mxu0  ;;  %v593_v28 = vpop.f32.mrf.mxu1 }
 0x219   :  { %v610_v59 = vadd.f32 %v580_v13, %v1828_v48  ;;  %v611_v60 = vadd.f32 %v593_v28, %v155_v4 }
 0x21b   :  { %v1282_v32 = vmul.f32 -1.442695, %v610_v59  ;;  %v1283_v1 = vmul.f32 -1.442695, %v611_v60 }
 0x21d   :  { %1351 = vpow2.f32 %v1282_v32 }
 0x21e   :  { %1353 = vpow2.f32 %v1283_v1  ;;  %v184_v1 = vadd.f32 %v1882_v41, %v1849_v51 }
 0x21f   :  { %v606_v12 = vpop.f32.mrf.mxu2 }
 0x220   :  { %v582_v19 = vpop.f32.mrf.mxu0  ;;  %v595_v20 = vpop.f32.mrf.mxu1  ;;  %v650_v59 = vadd.f32 %v1846_v35, %v606_v12 }
 0x223   :  { %v1352_v24 = vpop.eup %1351 }
 0x224   :  { %v1354_v25 = vpop.eup %1353  ;;  %v618_v27 = vadd.f32 1.0, %v1352_v24 }
 0x225   :  { %v619_v45 = vadd.f32 1.0, %v1354_v25 }
 0x226   :  { %1355 = vrcp.f32 %v618_v27  ;;  %v631_v8 = vand.u32 2147483648, %v618_v27  ;;  %v629_v37 = vand.u32 2147483647, %v618_v27  ;;  %vm625_vm2 = vweird.f32 %v618_v27 }
 0x227   :  { %1357 = vrcp.f32 %v619_v45  ;;  %v608_v0 = vpop.f32.mrf.mxu2  ;;  %v646_v19 = vand.u32 2147483648, %v619_v45  ;;  %vm640_vm6 = vweird.f32 %v619_v45  ;;  %v644_v24 = vand.u32 2147483647, %v619_v45 }
 0x228   :  { %v632_v13 = vor.u32 1.1754944e-38, %v631_v8  ;;  %vm630_vm4 = vcmp.eq.f32.partialorder %v629_v37, 8.507059e+37 }
 0x229   :  { %vm645_vm8 = vcmp.eq.f32.partialorder %v644_v24, 8.507059e+37 }
 0x22c   :  { %v1356_v38 = vpop.eup %1355 }
 0x22d   :  { %v1358_v21 = vpop.eup %1357  ;;  %v621_v2 = vmul.f32 %v1356_v38, %v618_v27  ;;  %vm626_vm1 = vweird.f32 %v1356_v38  ;;  %v647_v27 = vor.u32 1.1754944e-38, %v646_v19 }
 0x22e   :  { %v636_v61 = vmul.f32 %v1358_v21, %v619_v45  ;;  %vm627_vm3 = vmor %vm625_vm2, %vm626_vm1  ;;  %vm641_vm5 = vweird.f32 %v1358_v21 }
 0x22f   :  { %v622_v48 = vsub.f32 1.0, %v621_v2  ;;  %vm642_vm7 = vmor %vm640_vm6, %vm641_vm5 }
 0x230   :  { %v637_v33 = vsub.f32 1.0, %v636_v61 }
 0x231   :  { %v623_v6 = vmul.f32 %v1356_v38, %v622_v48 }
 0x232   :  { %v638_v42 = vmul.f32 %v1358_v21, %v637_v33 }
 0x233   :  { %v624_v4 = vadd.f32 %v1356_v38, %v623_v6 }
 0x234   :  { %v639_v32 = vadd.f32 %v1358_v21, %v638_v42 }
 0x235   :  { %v628_v28 = vsel %vm627_vm3, %v1356_v38, %v624_v4 }
 0x236   :  { %v633_v60 = vsel %vm630_vm4, %v632_v13, %v628_v28  ;;  %v643_v0 = vsel %vm642_vm7, %v1358_v21, %v639_v32 }
 0x237   :  { %v651_v20 = vmul.f32 %v650_v59, %v633_v60  ;;  %v648_v38 = vsel %vm645_vm8, %v647_v27, %v643_v0 }
 0x238   :  { %v654_v2 = vsub.f32 1.0, %v648_v38  ;;  %v656_v48 = vmul.f32 %v648_v38, %v1909_v10  ;;  %v157_v10 = vadd.f32 %v1884_v43, %v1838_v5 }
 0x239   :  { %v652_v25 = vadd.f32 %v651_v20, %v184_v1 }
 0x23b   :  { %1359 = vtanh.f32 %v652_v25 }
 0x241   :  { %v1360_v61 = vpop.eup %1359 }
 0x242   :  { %v655_v12 = vmul.f32 %v1360_v61, %v654_v2 }
 0x244   :  { %v1944_v33 = vadd.f32 %v656_v48, %v655_v12 }
 0x246   :  { %v661_v41 = vpack.c.bf16 %v1944_v33, %v1944_v33 }
 0x248   :  { %670 = vmatmul.bf16.vlgmr.msrb.gmra.mxu3 %v661_v41  ;;  %683 = vmatmul.bf16.vlgmr.msrb.gmra.mxu0 %v661_v41 }
 0x249   :  { %696 = vmatmul.bf16.vlgmr.msrb.gmra.mxu1 %v661_v41  ;;  %870 = vmatpush.bf16.msrb.mxu3 %v1516_v17 }
 0x24a   :  { %935 = vmatpush.bf16.msrb.mxu0 %v1488_v7  ;;  %948 = vmatpush.bf16.msrb.mxu1 %v1631_v55 }
 0x24d   :  { %871 = vmatpush.bf16.msrb.mxu3 %v1536_v23 }
 0x24e   :  { %936 = vmatpush.bf16.msrb.mxu0 %v1497_v11  ;;  %949 = vmatpush.bf16.msrb.mxu1 %v1667_v3 }
 0x251   :  { %872 = vmatpush.bf16.msrb.mxu3 %v1554_v29 }
 0x252   :  { %937 = vmatpush.bf16.msrb.mxu0 %v1519_v18  ;;  %950 = vmatpush.bf16.msrb.mxu1 %v1690_v14 }
 0x255   :  { %873 = vmatpush.bf16.msrb.mxu3 %v1575_v36 }
 0x256   :  { %938 = vmatpush.bf16.msrb.mxu0 %v1545_v26  ;;  %951 = vmatpush.bf16.msrb.mxu1 %v1709_v22 }
 0x259   :  { %874 = vmatpush.bf16.msrb.mxu3 %v1624_v53 }
 0x25a   :  { %939 = vmatpush.bf16.msrb.mxu0 %v1557_v30  ;;  %952 = vmatpush.bf16.msrb.mxu1 %v1723_v15 }
 0x25d   :  { %875 = vmatpush.bf16.msrb.mxu3 %v1654_v63 }
 0x25e   :  { %940 = vmatpush.bf16.msrb.mxu0 %v1581_v39  ;;  %953 = vmatpush.bf16.msrb.mxu1 %v1737_v31 }
 0x261   :  { %876 = vmatpush.bf16.msrb.mxu3 %v1679_v9 }
 0x262   :  { %941 = vmatpush.bf16.msrb.mxu0 %v1602_v46  ;;  %954 = vmatpush.bf16.msrb.mxu1 %v1749_v34 }
 0x265   :  { %877 = vmatpush.bf16.msrb.mxu3 %v1693_v16 }
 0x266   :  { %942 = vmatpush.bf16.msrb.mxu0 %v1628_v54  ;;  %955 = vmatpush.bf16.msrb.mxu1 %v1767_v40 }
 0x2c5   :  { %v684_v45 = vpop.f32.mrf.mxu0 }
 0x2c6   :  { %v702_v21 = vadd.f32 %v684_v45, %v157_v10  ;;  %v697_v8 = vpop.f32.mrf.mxu1 }
 0x2c7   :  { %v741_v41 = vadd.f32 %v1846_v35, %v697_v8 }
 0x2c8   :  { %v1285_v6 = vmul.f32 -1.442695, %v702_v21 }
 0x2ca   :  { %1361 = vpow2.f32 %v1285_v6  ;;  %v186_v6 = vadd.f32 %v1886_v44, %v1849_v51 }
 0x2cb   :  { %v671_v37 = vpop.f32.mrf.mxu3 }
 0x2cc   :  { %v701_v42 = vadd.f32 %v671_v37, %v1830_v50 }
 0x2cd   :  { %v686_v4 = vpop.f32.mrf.mxu0 }
 0x2ce   :  { %v1284_v13 = vmul.f32 -1.442695, %v701_v42  ;;  %v699_v28 = vpop.f32.mrf.mxu1 }
 0x2d0   :  { %v1362_v59 = vpop.eup %1361  ;;  %1363 = vpow2.f32 %v1284_v13 }
 0x2d1   :  { %v710_v60 = vadd.f32 1.0, %v1362_v59 }
 0x2d3   :  { %v673_v32 = vpop.f32.mrf.mxu3  ;;  %1365 = vrcp.f32 %v710_v60  ;;  %v737_v37 = vand.u32 2147483648, %v710_v60  ;;  %vm731_vm14 = vweird.f32 %v710_v60  ;;  %v735_v4 = vand.u32 2147483647, %v710_v60 }
 0x2d5   :  { %v738_v59 = vor.u32 1.1754944e-38, %v737_v37  ;;  %vm736_vm0 = vcmp.eq.f32.partialorder %v735_v4, 8.507059e+37 }
 0x2d6   :  { %v1364_v1 = vpop.eup %1363 }
 0x2d7   :  { %v709_v19 = vadd.f32 1.0, %v1364_v1 }
 0x2d9   :  { %1367 = vrcp.f32 %v709_v19  ;;  %v1366_v43 = vpop.eup %1365  ;;  %v722_v38 = vand.u32 2147483648, %v709_v19  ;;  %v720_v50 = vand.u32 2147483647, %v709_v19  ;;  %vm716_vm10 = vweird.f32 %v709_v19 }
 0x2da   :  { %v727_v20 = vmul.f32 %v1366_v43, %v710_v60  ;;  %vm732_vm13 = vweird.f32 %v1366_v43 }
 0x2db   :  { %v723_v48 = vor.u32 1.1754944e-38, %v722_v38  ;;  %vm721_vm12 = vcmp.eq.f32.partialorder %v720_v50, 8.507059e+37  ;;  %vm733_vm15 = vmor %vm731_vm14, %vm732_vm13 }
 0x2dc   :  { %v728_v0 = vsub.f32 1.0, %v727_v20 }
 0x2de   :  { %v729_v61 = vmul.f32 %v1366_v43, %v728_v0 }
 0x2df   :  { %v1368_v24 = vpop.eup %1367 }
 0x2e0   :  { %v712_v25 = vmul.f32 %v1368_v24, %v709_v19  ;;  %vm717_vm9 = vweird.f32 %v1368_v24  ;;  %v730_v21 = vadd.f32 %v1366_v43, %v729_v61 }
 0x2e1   :  { %vm718_vm11 = vmor %vm716_vm10, %vm717_vm9 }
 0x2e2   :  { %v713_v27 = vsub.f32 1.0, %v712_v25  ;;  %v734_v28 = vsel %vm733_vm15, %v1366_v43, %v730_v21 }
 0x2e3   :  { %v739_v32 = vsel %vm736_vm0, %v738_v59, %v734_v28 }
 0x2e4   :  { %v714_v2 = vmul.f32 %v1368_v24, %v713_v27  ;;  %v745_v8 = vsub.f32 1.0, %v739_v32  ;;  %v747_v20 = vmul.f32 %v739_v32, %v1944_v33 }
 0x2e6   :  { %v715_v12 = vadd.f32 %v1368_v24, %v714_v2 }
 0x2e8   :  { %v719_v10 = vsel %vm718_vm11, %v1368_v24, %v715_v12 }
 0x2e9   :  { %v724_v45 = vsel %vm721_vm12, %v723_v48, %v719_v10  ;;  %v189_v10 = vadd.f32 %v1890_v49, %v1849_v51 }
 0x2ea   :  { %v742_v42 = vmul.f32 %v741_v41, %v724_v45 }
 0x2ec   :  { %v743_v13 = vadd.f32 %v742_v42, %v186_v6 }
 0x2ee   :  { %1369 = vtanh.f32 %v743_v13 }
 0x2f4   :  { %v1370_v1 = vpop.eup %1369 }
 0x2f5   :  { %v746_v19 = vmul.f32 %v1370_v1, %v745_v8 }
 0x2f7   :  { %v1979_v24 = vadd.f32 %v747_v20, %v746_v19 }
 0x2f9   :  { %v752_v44 = vpack.c.bf16 %v1979_v24, %v1979_v24 }
 0x2fb   :  { %761 = vmatmul.bf16.vlgmr.msrb.gmra.mxu2 %v752_v44  ;;  %774 = vmatmul.bf16.vlgmr.msra.gmra.mxu3 %v752_v44 }
 0x2fc   :  { %787 = vmatmul.bf16.vlgmr.msra.gmra.mxu0 %v752_v44  ;;  %961 = vmatpush.bf16.msrb.mxu2 %v1516_v17 }
 0x2fd   :  { %1026 = vmatpush.bf16.msra.mxu3 %v1488_v7  ;;  %1039 = vmatpush.bf16.msra.mxu0 %v1631_v55 }
 0x300   :  { %962 = vmatpush.bf16.msrb.mxu2 %v1536_v23 }
 0x301   :  { %1027 = vmatpush.bf16.msra.mxu3 %v1497_v11  ;;  %1040 = vmatpush.bf16.msra.mxu0 %v1667_v3  ;;  %v160_v11 = vadd.f32 %v1888_v47, %v1838_v5 }
 0x304   :  { %963 = vmatpush.bf16.msrb.mxu2 %v1554_v29 }
 0x305   :  { %1028 = vmatpush.bf16.msra.mxu3 %v1519_v18  ;;  %1041 = vmatpush.bf16.msra.mxu0 %v1690_v14 }
 0x308   :  { %964 = vmatpush.bf16.msrb.mxu2 %v1575_v36 }
 0x309   :  { %1029 = vmatpush.bf16.msra.mxu3 %v1545_v26  ;;  %1042 = vmatpush.bf16.msra.mxu0 %v1709_v22 }
 0x30c   :  { %965 = vmatpush.bf16.msrb.mxu2 %v1624_v53 }
 0x30d   :  { %1030 = vmatpush.bf16.msra.mxu3 %v1557_v30  ;;  %1043 = vmatpush.bf16.msra.mxu0 %v1723_v15 }
 0x310   :  { %966 = vmatpush.bf16.msrb.mxu2 %v1654_v63 }
 0x311   :  { %1031 = vmatpush.bf16.msra.mxu3 %v1581_v39  ;;  %1044 = vmatpush.bf16.msra.mxu0 %v1737_v31 }
 0x314   :  { %967 = vmatpush.bf16.msrb.mxu2 %v1679_v9 }
 0x315   :  { %1032 = vmatpush.bf16.msra.mxu3 %v1602_v46  ;;  %1045 = vmatpush.bf16.msra.mxu0 %v1749_v34 }
 0x318   :  { %968 = vmatpush.bf16.msrb.mxu2 %v1693_v16 }
 0x319   :  { %1033 = vmatpush.bf16.msra.mxu3 %v1628_v54  ;;  %1046 = vmatpush.bf16.msra.mxu0 %v1767_v40 }
 0x379   :  { %v788_v7 = vpop.f32.mrf.mxu0 }
 0x37a   :  { %v832_v61 = vadd.f32 %v1846_v35, %v788_v7 }
 0x37e   :  { %v762_v18 = vpop.f32.mrf.mxu2  ;;  %v775_v26 = vpop.f32.mrf.mxu3 }
 0x37f   :  { %v792_v30 = vadd.f32 %v762_v18, %v1832_v58  ;;  %v793_v39 = vadd.f32 %v775_v26, %v160_v11 }
 0x381   :  { %v1286_v55 = vmul.f32 -1.442695, %v792_v30  ;;  %v1287_v3 = vmul.f32 -1.442695, %v793_v39  ;;  %v790_v46 = vpop.f32.mrf.mxu0 }
 0x383   :  { %1371 = vpow2.f32 %v1286_v55 }
 0x384   :  { %1373 = vpow2.f32 %v1287_v3 }
 0x386   :  { %v764_v14 = vpop.f32.mrf.mxu2  ;;  %v777_v22 = vpop.f32.mrf.mxu3 }
 0x389   :  { %v1372_v15 = vpop.eup %1371 }
 0x38a   :  { %v1374_v54 = vpop.eup %1373  ;;  %v800_v31 = vadd.f32 1.0, %v1372_v15 }
 0x38b   :  { %v801_v34 = vadd.f32 1.0, %v1374_v54 }
 0x38c   :  { %1375 = vrcp.f32 %v800_v31  ;;  %v813_v58 = vand.u32 2147483648, %v800_v31  ;;  %v811_v27 = vand.u32 2147483647, %v800_v31  ;;  %vm807_vm2 = vweird.f32 %v800_v31 }
 0x38d   :  { %1377 = vrcp.f32 %v801_v34  ;;  %v828_v21 = vand.u32 2147483648, %v801_v34  ;;  %vm822_vm6 = vweird.f32 %v801_v34  ;;  %v826_v6 = vand.u32 2147483647, %v801_v34 }
 0x38e   :  { %v814_v50 = vor.u32 1.1754944e-38, %v813_v58  ;;  %vm812_vm4 = vcmp.eq.f32.partialorder %v811_v27, 8.507059e+37 }
 0x38f   :  { %v829_v4 = vor.u32 1.1754944e-38, %v828_v21  ;;  %vm827_vm8 = vcmp.eq.f32.partialorder %v826_v6, 8.507059e+37  ;;  %v2066_v21 = vld [vmem:[#allocation6_spill] sm:$0xff] }
 0x392   :  { %v1376_v40 = vpop.eup %1375 }
 0x393   :  { %v1378_v47 = vpop.eup %1377  ;;  %v803_v33 = vmul.f32 %v1376_v40, %v800_v31  ;;  %vm808_vm1 = vweird.f32 %v1376_v40 }
 0x394   :  { %v818_v60 = vmul.f32 %v1378_v47, %v801_v34  ;;  %vm809_vm3 = vmor %vm807_vm2, %vm808_vm1  ;;  %vm823_vm5 = vweird.f32 %v1378_v47  ;;  %v191_v34 = vadd.f32 %v1894_v56, %v1849_v51 }
 0x395   :  { %v804_v43 = vsub.f32 1.0, %v803_v33  ;;  %vm824_vm7 = vmor %vm822_vm6, %vm823_vm5 }
 0x396   :  { %v819_v25 = vsub.f32 1.0, %v818_v60 }
 0x397   :  { %v805_v0 = vmul.f32 %v1376_v40, %v804_v43 }
 0x398   :  { %v820_v38 = vmul.f32 %v1378_v47, %v819_v25 }
 0x399   :  { %v806_v2 = vadd.f32 %v1376_v40, %v805_v0 }
 0x39a   :  { %v821_v41 = vadd.f32 %v1378_v47, %v820_v38 }
 0x39b   :  { %v810_v12 = vsel %vm809_vm3, %v1376_v40, %v806_v2 }
 0x39c   :  { %v815_v48 = vsel %vm812_vm4, %v814_v50, %v810_v12  ;;  %v825_v42 = vsel %vm824_vm7, %v1378_v47, %v821_v41  ;;  %v165_v41 = vadd.f32 %v1896_v57, %v1838_v5 }
 0x39d   :  { %v833_v45 = vmul.f32 %v832_v61, %v815_v48  ;;  %v830_v13 = vsel %vm827_vm8, %v829_v4, %v825_v42 }
 0x39e   :  { %v836_v28 = vsub.f32 1.0, %v830_v13  ;;  %v838_v8 = vmul.f32 %v830_v13, %v1979_v24 }
 0x39f   :  { %v834_v37 = vadd.f32 %v833_v45, %v189_v10 }
 0x3a1   :  { %1379 = vtanh.f32 %v834_v37 }
 0x3a7   :  { %v1380_v59 = vpop.eup %1379 }
 0x3a8   :  { %v837_v32 = vmul.f32 %v1380_v59, %v836_v28 }
 0x3aa   :  { %v2014_v1 = vadd.f32 %v838_v8, %v837_v32 }
 0x3ac   :  { %v843_v49 = vpack.c.bf16 %v2014_v1, %v2014_v1 }
 0x3ae   :  { %852 = vmatmul.bf16.vlgmr.msra.gmra.mxu1 %v843_v49  ;;  %865 = vmatmul.bf16.vlgmr.msra.gmra.mxu2 %v843_v49 }
 0x3af   :  { %878 = vmatmul.bf16.vlgmr.msrb.gmra.mxu3 %v843_v49  ;;  %1052 = vmatpush.bf16.msra.mxu1 %v1516_v17  ;;  %v162_v17 = vadd.f32 %v1892_v52, %v1838_v5 }
 0x3b3   :  { %1053 = vmatpush.bf16.msra.mxu1 %v1536_v23 }
 0x3b7   :  { %1054 = vmatpush.bf16.msra.mxu1 %v1554_v29 }
 0x3bb   :  { %1055 = vmatpush.bf16.msra.mxu1 %v1575_v36 }
 0x3bf   :  { %1056 = vmatpush.bf16.msra.mxu1 %v1624_v53 }
 0x3c3   :  { %1057 = vmatpush.bf16.msra.mxu1 %v1654_v63 }
 0x3c7   :  { %1058 = vmatpush.bf16.msra.mxu1 %v1679_v9 }
 0x3cb   :  { %1059 = vmatpush.bf16.msra.mxu1 %v1693_v16 }
 0x42b   :  { %v853_v19 = vpop.f32.mrf.mxu1 }
 0x42c   :  { %v883_v20 = vadd.f32 %v853_v19, %v1834_v62 }
 0x42e   :  { %v1288_v24 = vmul.f32 -1.442695, %v883_v20 }
 0x430   :  { %1381 = vpow2.f32 %v1288_v24 }
 0x431   :  { %v866_v23 = vpop.f32.mrf.mxu2 }
 0x432   :  { %v884_v29 = vadd.f32 %v866_v23, %v162_v17  ;;  %v879_v44 = vpop.f32.mrf.mxu3 }
 0x433   :  { %v855_v36 = vpop.f32.mrf.mxu1  ;;  %v923_v31 = vadd.f32 %v1846_v35, %v879_v44 }
 0x434   :  { %v1289_v7 = vmul.f32 -1.442695, %v884_v29 }
 0x436   :  { %v1382_v53 = vpop.eup %1381  ;;  %1383 = vpow2.f32 %v1289_v7 }
 0x437   :  { %v891_v63 = vadd.f32 1.0, %v1382_v53 }
 0x439   :  { %1385 = vrcp.f32 %v891_v63  ;;  %v868_v9 = vpop.f32.mrf.mxu2  ;;  %v904_v39 = vand.u32 2147483648, %v891_v63  ;;  %v902_v55 = vand.u32 2147483647, %v891_v63  ;;  %vm898_vm10 = vweird.f32 %v891_v63 }
 0x43a   :  { %v881_v11 = vpop.f32.mrf.mxu3 }
 0x43b   :  { %v905_v22 = vor.u32 1.1754944e-38, %v904_v39  ;;  %vm903_vm12 = vcmp.eq.f32.partialorder %v902_v55, 8.507059e+37 }
 0x43c   :  { %v1384_v16 = vpop.eup %1383 }
 0x43d   :  { %v892_v18 = vadd.f32 1.0, %v1384_v16 }
 0x43f   :  { %v1386_v26 = vpop.eup %1385  ;;  %1387 = vrcp.f32 %v892_v18  ;;  %v919_v33 = vand.u32 2147483648, %v892_v18  ;;  %v917_v43 = vand.u32 2147483647, %v892_v18  ;;  %vm913_vm14 = vweird.f32 %v892_v18 }
 0x440   :  { %v894_v62 = vmul.f32 %v1386_v26, %v891_v63  ;;  %vm899_vm9 = vweird.f32 %v1386_v26 }
 0x441   :  { %vm900_vm11 = vmor %vm898_vm10, %vm899_vm9  ;;  %v920_v0 = vor.u32 1.1754944e-38, %v919_v33  ;;  %vm918_vm0 = vcmp.eq.f32.partialorder %v917_v43, 8.507059e+37 }
 0x442   :  { %v895_v30 = vsub.f32 1.0, %v894_v62  ;;  %v2067_v62 = vld [vmem:[#allocation8_spill] sm:$0xff] }
 0x444   :  { %v896_v52 = vmul.f32 %v1386_v26, %v895_v30  ;;  %v194_v30 = vadd.f32 %v2067_v62, %v1849_v51 }
 0x445   :  { %v1388_v3 = vpop.eup %1387 }
 0x446   :  { %v909_v46 = vmul.f32 %v1388_v3, %v892_v18  ;;  %v897_v14 = vadd.f32 %v1386_v26, %v896_v52  ;;  %vm914_vm13 = vweird.f32 %v1388_v3 }
 0x447   :  { %vm915_vm15 = vmor %vm913_vm14, %vm914_vm13 }
 0x448   :  { %v910_v15 = vsub.f32 1.0, %v909_v46  ;;  %v901_v54 = vsel %vm900_vm11, %v1386_v26, %v897_v14 }
 0x449   :  { %v906_v40 = vsel %vm903_vm12, %v905_v22, %v901_v54 }
 0x44a   :  { %v911_v47 = vmul.f32 %v1388_v3, %v910_v15  ;;  %v924_v60 = vmul.f32 %v923_v31, %v906_v40 }
 0x44c   :  { %v925_v58 = vadd.f32 %v924_v60, %v191_v34  ;;  %v912_v25 = vadd.f32 %v1388_v3, %v911_v47  ;;  %v2068_v47 = vld [vmem:[#allocation9_spill] sm:$0xff] }
 0x44d   :  { %v167_v33 = vadd.f32 %v2068_v47, %v1838_v5 }
 0x44e   :  { %1389 = vtanh.f32 %v925_v58  ;;  %v916_v27 = vsel %vm915_vm15, %v1388_v3, %v912_v25 }
 0x44f   :  { %v921_v38 = vsel %vm918_vm0, %v920_v0, %v916_v27  ;;  %v2069_v27 = vld [vmem:[#allocation7_spill] sm:$0xff] }
 0x450   :  { %v927_v2 = vsub.f32 1.0, %v921_v38  ;;  %v929_v56 = vmul.f32 %v921_v38, %v2014_v1 }
 0x454   :  { %v1390_v50 = vpop.eup %1389 }
 0x455   :  { %v928_v61 = vmul.f32 %v1390_v50, %v927_v2 }
 0x457   :  { %v930_v12 = vadd.f32 %v929_v56, %v928_v61 }
 0x459   :  { %v934_v48 = vpack.c.bf16 %v930_v12, %v930_v12 }
 0x45b   :  { %943 = vmatmul.bf16.vlgmr.msrb.gmra.mxu0 %v934_v48  ;;  %956 = vmatmul.bf16.vlgmr.msrb.gmra.mxu1 %v934_v48 }
 0x45c   :  { %969 = vmatmul.bf16.vlgmr.msrb.gmra.mxu2 %v934_v48 }
 0x4d8   :  { %v944_v10 = vpop.f32.mrf.mxu0  ;;  %v957_v45 = vpop.f32.mrf.mxu1 }
 0x4d9   :  { %v974_v6 = vadd.f32 %v944_v10, %v2066_v21  ;;  %v975_v37 = vadd.f32 %v957_v45, %v165_v41 }
 0x4db   :  { %v1290_v42 = vmul.f32 -1.442695, %v974_v6  ;;  %v1291_v4 = vmul.f32 -1.442695, %v975_v37 }
 0x4dd   :  { %1391 = vpow2.f32 %v1290_v42 }
 0x4de   :  { %1393 = vpow2.f32 %v1291_v4 }
 0x4df   :  { %v970_v13 = vpop.f32.mrf.mxu2 }
 0x4e0   :  { %v946_v28 = vpop.f32.mrf.mxu0  ;;  %v959_v59 = vpop.f32.mrf.mxu1  ;;  %v1014_v16 = vadd.f32 %v1846_v35, %v970_v13 }
 0x4e3   :  { %v1392_v32 = vpop.eup %1391 }
 0x4e4   :  { %v1394_v8 = vpop.eup %1393  ;;  %v982_v1 = vadd.f32 1.0, %v1392_v32 }
 0x4e5   :  { %v983_v49 = vadd.f32 1.0, %v1394_v8 }
 0x4e6   :  { %1395 = vrcp.f32 %v982_v1  ;;  %v995_v44 = vand.u32 2147483648, %v982_v1  ;;  %v993_v7 = vand.u32 2147483647, %v982_v1  ;;  %vm989_vm2 = vweird.f32 %v982_v1 }
 0x4e7   :  { %1397 = vrcp.f32 %v983_v49  ;;  %v972_v19 = vpop.f32.mrf.mxu2  ;;  %v1010_v39 = vand.u32 2147483648, %v983_v49  ;;  %vm1004_vm6 = vweird.f32 %v983_v49  ;;  %v1008_v55 = vand.u32 2147483647, %v983_v49 }
 0x4e8   :  { %v996_v9 = vor.u32 1.1754944e-38, %v995_v44  ;;  %vm994_vm4 = vcmp.eq.f32.partialorder %v993_v7, 8.507059e+37 }
 0x4e9   :  { %v1011_v14 = vor.u32 1.1754944e-38, %v1010_v39  ;;  %vm1009_vm8 = vcmp.eq.f32.partialorder %v1008_v55, 8.507059e+37 }
 0x4ec   :  { %v1396_v57 = vpop.eup %1395 }
 0x4ed   :  { %v1398_v20 = vpop.eup %1397  ;;  %v985_v24 = vmul.f32 %v1396_v57, %v982_v1  ;;  %vm990_vm1 = vweird.f32 %v1396_v57  ;;  %v1411_v1 = vld [vmem:[%s2059_s4] ss:$0 sm:$0xff]  ;;  %s1439_s4 = smov [#allocation3]  }
 0x4ee   :  { %v1000_v17 = vmul.f32 %v1398_v20, %v983_v49  ;;  %vm991_vm3 = vmor %vm989_vm2, %vm990_vm1  ;;  %vm1005_vm5 = vweird.f32 %v1398_v20  ;;  %s1119_s22 = sshll.u32 %s1439_s4, 4  ;;  %s1120_s22 = int_to_ptr.vmem [resolvable:$true] %s1119_s22 }
 0x4ef   :  { %v986_v23 = vsub.f32 1.0, %v985_v24  ;;  %vm1006_vm7 = vmor %vm1004_vm6, %vm1005_vm5  ;;  %v2070_v24 = vld [vmem:[#allocation10_spill] sm:$0xff] }
 0x4f0   :  { %v1001_v29 = vsub.f32 1.0, %v1000_v17  ;;  %v196_v17 = vadd.f32 %v2070_v24, %v1849_v51 }
 0x4f1   :  { %v987_v36 = vmul.f32 %v1396_v57, %v986_v23 }
 0x4f2   :  { %v1002_v53 = vmul.f32 %v1398_v20, %v1001_v29 }
 0x4f3   :  { %v988_v63 = vadd.f32 %v1396_v57, %v987_v36 }
 0x4f4   :  { %v1003_v26 = vadd.f32 %v1398_v20, %v1002_v53 }
 0x4f5   :  { %v992_v11 = vsel %vm991_vm3, %v1396_v57, %v988_v63 }
 0x4f6   :  { %v997_v18 = vsel %vm994_vm4, %v996_v9, %v992_v11  ;;  %v1007_v46 = vsel %vm1006_vm7, %v1398_v20, %v1003_v26 }
 0x4f7   :  { %v1015_v52 = vmul.f32 %v1014_v16, %v997_v18  ;;  %v1012_v22 = vsel %vm1009_vm8, %v1011_v14, %v1007_v46 }
 0x4f8   :  { %v1018_v15 = vsub.f32 1.0, %v1012_v22  ;;  %v1020_v31 = vmul.f32 %v1012_v22, %v930_v12 }
 0x4f9   :  { %v1016_v3 = vadd.f32 %v1015_v52, %v194_v30 }
 0x4fb   :  { %1399 = vtanh.f32 %v1016_v3 }
 0x501   :  { %v1400_v54 = vpop.eup %1399 }
 0x502   :  { %v1019_v35 = vmul.f32 %v1400_v54, %v1018_v15 }
 0x504   :  { %v2039_v34 = vadd.f32 %v1020_v31, %v1019_v35 }
 0x506   :  { %v1025_v40 = vpack.c.bf16 %v2039_v34, %v2039_v34 }
 0x508   :  { %1034 = vmatmul.bf16.vlgmr.msra.gmra.mxu3 %v1025_v40  ;;  %1047 = vmatmul.bf16.vlgmr.msra.gmra.mxu0 %v1025_v40 }
 0x509   :  { %1060 = vmatmul.bf16.vlgmr.msra.gmra.mxu1 %v1025_v40 }
 0x585   :  { %v1048_v60 = vpop.f32.mrf.mxu0 }
 0x586   :  { %v1066_v43 = vadd.f32 %v1048_v60, %v167_v33  ;;  %v1061_v58 = vpop.f32.mrf.mxu1 }
 0x587   :  { %v1105_v49 = vadd.f32 %v1411_v1, %v1061_v58 }
 0x588   :  { %v1293_v25 = vmul.f32 -1.442695, %v1066_v43 }
 0x58a   :  { %1401 = vpow2.f32 %v1293_v25 }
 0x58b   :  { %v1035_v0 = vpop.f32.mrf.mxu3 }
 0x58c   :  { %v1065_v38 = vadd.f32 %v1035_v0, %v2069_v27 }
 0x58d   :  { %v1050_v2 = vpop.f32.mrf.mxu0 }
 0x58e   :  { %v1292_v50 = vmul.f32 -1.442695, %v1065_v38  ;;  %v1063_v61 = vpop.f32.mrf.mxu1 }
 0x590   :  { %v1402_v56 = vpop.eup %1401  ;;  %1403 = vpow2.f32 %v1292_v50 }
 0x591   :  { %v1074_v12 = vadd.f32 1.0, %v1402_v56 }
 0x593   :  { %v1037_v48 = vpop.f32.mrf.mxu3  ;;  %1405 = vrcp.f32 %v1074_v12  ;;  %v1101_v23 = vand.u32 2147483648, %v1074_v12  ;;  %vm1095_vm14 = vweird.f32 %v1074_v12  ;;  %v1099_v44 = vand.u32 2147483647, %v1074_v12 }
 0x595   :  { %v1102_v53 = vor.u32 1.1754944e-38, %v1101_v23  ;;  %vm1100_vm0 = vcmp.eq.f32.partialorder %v1099_v44, 8.507059e+37 }
 0x596   :  { %v1404_v41 = vpop.eup %1403 }
 0x597   :  { %v1073_v10 = vadd.f32 1.0, %v1404_v41 }
 0x599   :  { %1407 = vrcp.f32 %v1073_v10  ;;  %v1406_v5 = vpop.eup %1405  ;;  %v1086_v4 = vand.u32 2147483648, %v1073_v10  ;;  %v1084_v28 = vand.u32 2147483647, %v1073_v10  ;;  %vm1080_vm10 = vweird.f32 %v1073_v10 }
 0x59a   :  { %v1091_v45 = vmul.f32 %v1406_v5, %v1074_v12  ;;  %vm1096_vm13 = vweird.f32 %v1406_v5 }
 0x59b   :  { %v1087_v8 = vor.u32 1.1754944e-38, %v1086_v4  ;;  %vm1085_vm12 = vcmp.eq.f32.partialorder %v1084_v28, 8.507059e+37  ;;  %vm1097_vm15 = vmor %vm1095_vm14, %vm1096_vm13 }
 0x59c   :  { %v1092_v37 = vsub.f32 1.0, %v1091_v45 }
 0x59e   :  { %v1093_v59 = vmul.f32 %v1406_v5, %v1092_v37 }
 0x59f   :  { %v1408_v21 = vpop.eup %1407 }
 0x5a0   :  { %v1076_v6 = vmul.f32 %v1408_v21, %v1073_v10  ;;  %vm1081_vm9 = vweird.f32 %v1408_v21  ;;  %v1094_v20 = vadd.f32 %v1406_v5, %v1093_v59 }
 0x5a1   :  { %vm1082_vm11 = vmor %vm1080_vm10, %vm1081_vm9 }
 0x5a2   :  { %v1077_v42 = vsub.f32 1.0, %v1076_v6  ;;  %v1098_v7 = vsel %vm1097_vm15, %v1406_v5, %v1094_v20 }
 0x5a3   :  { %v1103_v63 = vsel %vm1100_vm0, %v1102_v53, %v1098_v7 }
 0x5a4   :  { %v1078_v13 = vmul.f32 %v1408_v21, %v1077_v42  ;;  %v1109_v9 = vsub.f32 1.0, %v1103_v63  ;;  %v1111_v16 = vmul.f32 %v1103_v63, %v2039_v34 }
 0x5a6   :  { %v1079_v32 = vadd.f32 %v1408_v21, %v1078_v13 }
 0x5a8   :  { %v1083_v19 = vsel %vm1082_vm11, %v1408_v21, %v1079_v32 }
 0x5a9   :  { %v1088_v57 = vsel %vm1085_vm12, %v1087_v8, %v1083_v19 }
 0x5aa   :  { %v1106_v29 = vmul.f32 %v1105_v49, %v1088_v57 }
 0x5ac   :  { %v1107_v36 = vadd.f32 %v1106_v29, %v196_v17 }
 0x5ae   :  { %1409 = vtanh.f32 %v1107_v36 }
 0x5b4   :  { %v1410_v11 = vpop.eup %1409 }
 0x5b5   :  { %v1110_v51 = vmul.f32 %v1410_v11, %v1109_v9 }
 0x5b7   :  { %v1112_v18 = vadd.f32 %v1111_v16, %v1110_v51 }
 0x5b9   :  { %1113 = vst [vmem:[#allocation3] sm:$0xff] %v1112_v18 }
 0x5ba   :  { %1124 = dma.vmem_to_hbm [thread:$0]  %s1120_s22, 128, %s1122_s25, [#allocation4]  }
 0x5bb   :  { %1436 = dma.done.wait [#allocation4], 128  }
 0x5bc   :  { %1437 = vsyncadd [#allocation4], 4294967168 }
 0x5bd   :  { %1129 = vsyncpa [#allocation4], 1 }

</bundles_post_ra>
